<compile_context>
chip_gen: v5e
topology: v5e:2x2
jax: 0.10.0
libtpu: 0.0.40
codegen_flags: <defaults>
</compile_context>

<pallas_src>
import math

import jax
import jax.numpy as jnp
from jax.experimental import pallas as pl
from jax.experimental.pallas import tpu as pltpu


def _round_up(a, m):
    return ((a + m - 1) // m) * m


def _cdiv(a, b):
    return (a + b - 1) // b


def autoencoder_kernel(x_ref,
                       w1_ref, b1_ref,
                       w23_ref, b23_ref,
                       w4_ref, b4_ref,
                       o_ref):
    """Fused packed-layout MLP: 3 MXU matmuls + ReLU/ReLU/Tanh, no relayouts.

    x_ref / o_ref are (rb, lane_w) lane-dense tiles holding `pack` logical
    batch rows per packed row.  w*_ref are pack-replicated block-diagonal
    weights (MXU operand dtype), b*_ref are pack-tiled f32 biases, so the whole
    MLP runs directly in the packed layout: all elementwise work and the final
    store use all 128 lanes, and no reshape/transpose ever touches the XLU.
    """
    x = x_ref[...]
    mdt = w1_ref.dtype                      # MXU operand dtype (f32 or bf16)

    # encoder Linear(input, 64) + ReLU   (f32 accumulation, f32 bias/ReLU)
    h1 = jnp.dot(x.astype(mdt), w1_ref[...],
                 preferred_element_type=jnp.float32) + b1_ref[...]
    h1 = jnp.maximum(h1, 0.0)

    # fused [encoder Linear(64, emb)] @ [decoder Linear(emb, 64)] + ReLU
    h2 = jnp.dot(h1.astype(mdt), w23_ref[...],
                 preferred_element_type=jnp.float32) + b23_ref[...]
    h2 = jnp.maximum(h2, 0.0)

    # decoder Linear(64, input) + Tanh   (tanh on the full-lane packed tile)
    y = jnp.dot(h2.astype(mdt), w4_ref[...],
                preferred_element_type=jnp.float32) + b4_ref[...]
    o_ref[...] = jnp.tanh(y).astype(o_ref.dtype)


def stock_autoencoder_forward(x, params, *, block_b=8192,
                              io_dtype=None, mxu_dtype=None):
    """Forward pass of StockAutoencoder.

    x: (B, input_size).  params: dict of (in, out) weights + (1, out) biases.
    block_b:   logical batch rows per grid step (rounded to alignment; large
               batches keep >= 4 grid steps for v7x's two TensorCores).
    io_dtype:  dtype streamed HBM<->VMEM for x/out (default: x.dtype).
               jnp.bfloat16 halves HBM traffic on v6e/v7x.
    mxu_dtype: matmul operand dtype (weights + activation casts at the dot
               inputs).  Default follows io_dtype.  bf16 cuts MXU passes
               ~3-6x; accumulation, biases and elementwise math stay f32.
    """
    B, F = x.shape
    if io_dtype is None:
        io_dtype = x.dtype
    if mxu_dtype is None:
        mxu_dtype = io_dtype

    f32 = jnp.float32
    w1 = params["w1"].astype(f32)   # (F, 64)
    b1 = params["b1"].astype(f32)   # (1, 64)
    w2 = params["w2"].astype(f32)   # (64, E)
    b2 = params["b2"].astype(f32)   # (1, E)
    w3 = params["w3"].astype(f32)   # (E, 64)
    b3 = params["b3"].astype(f32)   # (1, 64)
    w4 = params["w4"].astype(f32)   # (64, F)
    b4 = params["b4"].astype(f32)   # (1, F)
    H = w1.shape[1]

    # Fuse encoder-Linear2 with decoder-Linear1 (no nonlinearity in between).
    w23 = w2 @ w3                   # (H, H)
    b23 = b2 @ w3 + b3              # (1, H)

    # Pad the feature dim to a multiple of 16 so the lane-packing factor stays
    # <= 8 (keeps block-diag weights and the packed hidden width <= 512 small).
    F_pad = max(16, _round_up(F, 16))
    if F_pad != F:
        w1 = jnp.pad(w1, ((0, F_pad - F), (0, 0)))
        w4 = jnp.pad(w4, ((0, 0), (0, F_pad - F)))
        b4 = jnp.pad(b4, ((0, 0), (0, F_pad - F)))

    pack = 128 // math.gcd(F_pad, 128)      # logical rows per packed row (<=8)
    lane_w = F_pad * pack                   # multiple of 128
    Hp = H * pack                           # packed hidden width (<=512)

    # Pack-replicated block-diagonal weights / pack-tiled f32 biases.  Built
    # once in the wrapper; constant index_maps keep them VMEM-resident across
    # all grid steps (~1.5 MiB f32 total at pack=8).
    eye = jnp.eye(pack, dtype=f32)
    w1_pk = jnp.kron(eye, w1).astype(mxu_dtype)     # (lane_w, Hp)
    w23_pk = jnp.kron(eye, w23).astype(mxu_dtype)   # (Hp, Hp)
    w4_pk = jnp.kron(eye, w4).astype(mxu_dtype)     # (Hp, lane_w)
    b1_pk = jnp.tile(b1, (1, pack))                 # (1, Hp)      f32
    b23_pk = jnp.tile(b23, (1, pack))               # (1, Hp)      f32
    b4_pk = jnp.tile(b4, (1, pack))                 # (1, lane_w)  f32

    # Batch tiling: big tiles to amortize per-step overhead, but keep >= 4 grid
    # steps for large batches (v7x dual-TC sharding + DMA/compute pipelining);
    # never shrink below ~2048-row tiles where step overhead dominates.
    align = 8 * pack                        # 8 sublanes worth of packed rows
    block_b = _round_up(max(block_b, align), align)
    block_b = min(block_b, _round_up(B, align))
    four_step = _round_up(_cdiv(B, 4), align)
    if four_step >= 2048:
        block_b = min(block_b, four_step)
    Bp = _round_up(B, block_b)

    x = x.astype(io_dtype)
    if Bp != B or F_pad != F:
        x = jnp.pad(x, ((0, Bp - B), (0, F_pad - F)))
    x2 = x.reshape(Bp // pack, lane_w)      # contiguous reshape: free

    rb = block_b // pack                    # packed rows per tile (mult. of 8)
    grid = (Bp // block_b,)
    batch_map = lambda i: (i, 0)
    const_map = lambda i: (0, 0)

    out2 = pl.pallas_call(
        autoencoder_kernel,
        out_shape=jax.ShapeDtypeStruct((Bp // pack, lane_w), io_dtype),
        grid_spec=pltpu.PrefetchScalarGridSpec(
            num_scalar_prefetch=0,
            grid=grid,
            in_specs=[
                pl.BlockSpec((rb, lane_w), batch_map),    # x  (lane-dense)
                pl.BlockSpec((lane_w, Hp), const_map),    # W1  block-diag
                pl.BlockSpec((1, Hp), const_map),         # b1  tiled
                pl.BlockSpec((Hp, Hp), const_map),        # W2@W3 block-diag
                pl.BlockSpec((1, Hp), const_map),         # b23 tiled
                pl.BlockSpec((Hp, lane_w), const_map),    # W4  block-diag
                pl.BlockSpec((1, lane_w), const_map),     # b4  tiled
            ],
            out_specs=pl.BlockSpec((rb, lane_w), batch_map),
        ),
        compiler_params=pltpu.CompilerParams(
            dimension_semantics=("parallel",)),
    )(x2, w1_pk, b1_pk, w23_pk, b23_pk, w4_pk, b4_pk)

    out = out2.reshape(Bp, F_pad)           # contiguous reshape: free
    if Bp != B or F_pad != F:
        out = out[:B, :F]
    return out


def init_params(key, input_size, embedding_dim=32, hidden=64):
    """Deterministic synthetic parameters, PyTorch-Linear-like uniform init."""
    def linear(k, fan_in, fan_out):
        kw, kb = jax.random.split(k)
        bound = 1.0 / jnp.sqrt(fan_in)
        # stored as (in, out) so the forward does x @ W
        w = jax.random.uniform(kw, (fan_in, fan_out), jnp.float32, -bound, bound)
        b = jax.random.uniform(kb, (1, fan_out), jnp.float32, -bound, bound)
        return w, b

    k1, k2, k3, k4 = jax.random.split(key, 4)
    w1, b1 = linear(k1, input_size, hidden)        # encoder Linear(input, 64)
    w2, b2 = linear(k2, hidden, embedding_dim)     # encoder Linear(64, emb)
    w3, b3 = linear(k3, embedding_dim, hidden)     # decoder Linear(emb, 64)
    w4, b4 = linear(k4, hidden, input_size)        # decoder Linear(64, input)
    return dict(w1=w1, b1=b1, w2=w2, b2=b2, w3=w3, b3=b3, w4=w4, b4=b4)


def reference_forward(x, p):
    """Pure-JAX reference for correctness checking."""
    h = jnp.maximum(x @ p["w1"] + p["b1"], 0.0)
    z = h @ p["w2"] + p["b2"]
    h = jnp.maximum(z @ p["w3"] + p["b3"], 0.0)
    return jnp.tanh(h @ p["w4"] + p["b4"])


if __name__ == "__main__":
    key = jax.random.PRNGKey(0)
    kx, kp = jax.random.split(key)

    batch = 64
    input_size = 16          # per-stock feature vector length
    embedding_dim = 32

    x = jax.random.normal(kx, (batch, input_size), jnp.float32)
    params = init_params(kp, input_size, embedding_dim)
    ref = reference_forward(x, params)

    # small-batch f32 path (single grid step)
    out = jax.block_until_ready(stock_autoencoder_forward(x, params))
    assert out.shape == (batch, input_size)
    assert jnp.allclose(out, ref, atol=1e-4, rtol=1e-4), "mismatch (f32)"

    # larger ragged batch: multi-step grid + batch padding + packed tiles
    xb = jax.random.normal(kx, (1000, input_size), jnp.float32)
    refb = reference_forward(xb, params)
    outb = jax.block_until_ready(
        stock_autoencoder_forward(xb, params, block_b=256))
    assert outb.shape == (1000, input_size)
    assert jnp.allclose(outb, refb, atol=1e-4, rtol=1e-4), "mismatch (tiled f32)"

    # bf16 MXU operands with f32 streaming (perf mode, esp. v6e/v7x)
    outm = jax.block_until_ready(
        stock_autoencoder_forward(xb, params, block_b=256,
                                  mxu_dtype=jnp.bfloat16))
    assert jnp.allclose(outm, refb, atol=5e-2, rtol=5e-2), "mismatch (bf16 MXU)"

    # full bf16 streaming + bf16 MXU (halves HBM traffic)
    outbf = jax.block_until_ready(
        stock_autoencoder_forward(xb, params, block_b=256,
                                  io_dtype=jnp.bfloat16,
                                  mxu_dtype=jnp.bfloat16))
    assert jnp.allclose(outbf.astype(jnp.float32), refb,
                        atol=5e-2, rtol=5e-2), "mismatch (bf16 I/O)"

    # non-multiple-of-16 feature width: exercises the feature-dim padding path
    x3 = jax.random.normal(kx, (50, 10), jnp.float32)
    p3 = init_params(kp, 10, 8)
    out3 = jax.block_until_ready(stock_autoencoder_forward(x3, p3))
    assert out3.shape == (50, 10)
    assert jnp.allclose(out3, reference_forward(x3, p3),
                        atol=1e-4, rtol=1e-4), "mismatch (padded F)"

    print("KERNEL_OK")
</pallas_src>

<mosaic_0001>
module attributes {stable_mosaic.version = 11 : i64} {
  func.func @autoencoder_kernel(%arg0: i32, %arg1: memref<8x128xf32, #tpu.memory_space<vmem>>, %arg2: memref<128x512xf32, #tpu.memory_space<vmem>>, %arg3: memref<1x512xf32, #tpu.memory_space<vmem>>, %arg4: memref<512x512xf32, #tpu.memory_space<vmem>>, %arg5: memref<1x512xf32, #tpu.memory_space<vmem>>, %arg6: memref<512x128xf32, #tpu.memory_space<vmem>>, %arg7: memref<1x128xf32, #tpu.memory_space<vmem>>, %arg8: memref<8x128xf32, #tpu.memory_space<vmem>>) attributes {dimension_semantics = [#tpu.dimension_semantics<parallel>], iteration_bounds = array<i64: 1>, scalar_prefetch = 0 : i64, scratch_operands = 0 : i64, tpu.core_type = #tpu.core_type<tc>, window_params = [{transform_indices = @transform_0, window_bounds = array<i64: 8, 128>}, {pipeline_mode = #tpu.pipeline_mode<synchronous>, transform_indices = @transform_1, window_bounds = array<i64: 128, 512>}, {pipeline_mode = #tpu.pipeline_mode<synchronous>, transform_indices = @transform_2, window_bounds = array<i64: 1, 512>}, {pipeline_mode = #tpu.pipeline_mode<synchronous>, transform_indices = @transform_3, window_bounds = array<i64: 512, 512>}, {pipeline_mode = #tpu.pipeline_mode<synchronous>, transform_indices = @transform_4, window_bounds = array<i64: 1, 512>}, {pipeline_mode = #tpu.pipeline_mode<synchronous>, transform_indices = @transform_5, window_bounds = array<i64: 512, 128>}, {pipeline_mode = #tpu.pipeline_mode<synchronous>, transform_indices = @transform_6, window_bounds = array<i64: 1, 128>}, {transform_indices = @transform_7, window_bounds = array<i64: 8, 128>}]} {
    %c0 = arith.constant 0 : index
    %c0_0 = arith.constant 0 : index
    %0 = vector.load %arg1[%c0, %c0_0] : memref<8x128xf32, #tpu.memory_space<vmem>>, vector<8x128xf32>
    %c0_1 = arith.constant 0 : index
    %c0_2 = arith.constant 0 : index
    %1 = vector.load %arg2[%c0_1, %c0_2] : memref<128x512xf32, #tpu.memory_space<vmem>>, vector<128x512xf32>
    %cst = arith.constant dense<0.000000e+00> : vector<8x512xf32>
    %2 = tpu.matmul %0, %1, %cst {dimension_numbers = #tpu.dot_dimension_numbers<[1], [0], [0], [1], [0, 0, 1, 1], [], []>} : vector<8x128xf32>, vector<128x512xf32>, vector<8x512xf32> -> vector<8x512xf32>
    %c0_3 = arith.constant 0 : index
    %c0_4 = arith.constant 0 : index
    %3 = vector.load %arg3[%c0_3, %c0_4] : memref<1x512xf32, #tpu.memory_space<vmem>>, vector<1x512xf32>
    %4 = vector.broadcast %3 : vector<1x512xf32> to vector<8x512xf32>
    %5 = arith.addf %2, %4 : vector<8x512xf32>
    %cst_5 = arith.constant 0.000000e+00 : f32
    %6 = vector.broadcast %cst_5 : f32 to vector<8x512xf32>
    %7 = arith.maximumf %5, %6 : vector<8x512xf32>
    %c0_6 = arith.constant 0 : index
    %c0_7 = arith.constant 0 : index
    %8 = vector.load %arg4[%c0_6, %c0_7] : memref<512x512xf32, #tpu.memory_space<vmem>>, vector<512x512xf32>
    %cst_8 = arith.constant dense<0.000000e+00> : vector<8x512xf32>
    %9 = tpu.matmul %7, %8, %cst_8 {dimension_numbers = #tpu.dot_dimension_numbers<[1], [0], [0], [1], [0, 0, 1, 1], [], []>} : vector<8x512xf32>, vector<512x512xf32>, vector<8x512xf32> -> vector<8x512xf32>
    %c0_9 = arith.constant 0 : index
    %c0_10 = arith.constant 0 : index
    %10 = vector.load %arg5[%c0_9, %c0_10] : memref<1x512xf32, #tpu.memory_space<vmem>>, vector<1x512xf32>
    %11 = vector.broadcast %10 : vector<1x512xf32> to vector<8x512xf32>
    %12 = arith.addf %9, %11 : vector<8x512xf32>
    %cst_11 = arith.constant 0.000000e+00 : f32
    %13 = vector.broadcast %cst_11 : f32 to vector<8x512xf32>
    %14 = arith.maximumf %12, %13 : vector<8x512xf32>
    %c0_12 = arith.constant 0 : index
    %c0_13 = arith.constant 0 : index
    %15 = vector.load %arg6[%c0_12, %c0_13] : memref<512x128xf32, #tpu.memory_space<vmem>>, vector<512x128xf32>
    %cst_14 = arith.constant dense<0.000000e+00> : vector<8x128xf32>
    %16 = tpu.matmul %14, %15, %cst_14 {dimension_numbers = #tpu.dot_dimension_numbers<[1], [0], [0], [1], [0, 0, 1, 1], [], []>} : vector<8x512xf32>, vector<512x128xf32>, vector<8x128xf32> -> vector<8x128xf32>
    %c0_15 = arith.constant 0 : index
    %c0_16 = arith.constant 0 : index
    %17 = vector.load %arg7[%c0_15, %c0_16] : memref<1x128xf32, #tpu.memory_space<vmem>>, vector<1x128xf32>
    %18 = vector.broadcast %17 : vector<1x128xf32> to vector<8x128xf32>
    %19 = arith.addf %16, %18 : vector<8x128xf32>
    %20 = math.tanh %19 : vector<8x128xf32>
    %c0_17 = arith.constant 0 : index
    %c0_18 = arith.constant 0 : index
    %21 = vector.load %arg8[%c0_17, %c0_18] : memref<8x128xf32, #tpu.memory_space<vmem>>, vector<8x128xf32>
    tpu.vector_store %arg8[%c0_17, %c0_18], %20 {strides = array<i32>} : memref<8x128xf32, #tpu.memory_space<vmem>>, vector<8x128xf32>,
    return
  }
  func.func @transform_0(%arg0: i32) -> (i32, i32) {
    %c0_i32 = arith.constant 0 : i32
    %c0_i32_0 = arith.constant 0 : i32
    return %arg0, %c0_i32 : i32, i32
  }
  func.func @transform_1(%arg0: i32) -> (i32, i32) {
    %c0_i32 = arith.constant 0 : i32
    %c0_i32_0 = arith.constant 0 : i32
    %c0_i32_1 = arith.constant 0 : i32
    return %c0_i32, %c0_i32_0 : i32, i32
  }
  func.func @transform_2(%arg0: i32) -> (i32, i32) {
    %c0_i32 = arith.constant 0 : i32
    %c0_i32_0 = arith.constant 0 : i32
    %c0_i32_1 = arith.constant 0 : i32
    return %c0_i32, %c0_i32_0 : i32, i32
  }
  func.func @transform_3(%arg0: i32) -> (i32, i32) {
    %c0_i32 = arith.constant 0 : i32
    %c0_i32_0 = arith.constant 0 : i32
    %c0_i32_1 = arith.constant 0 : i32
    return %c0_i32, %c0_i32_0 : i32, i32
  }
  func.func @transform_4(%arg0: i32) -> (i32, i32) {
    %c0_i32 = arith.constant 0 : i32
    %c0_i32_0 = arith.constant 0 : i32
    %c0_i32_1 = arith.constant 0 : i32
    return %c0_i32, %c0_i32_0 : i32, i32
  }
  func.func @transform_5(%arg0: i32) -> (i32, i32) {
    %c0_i32 = arith.constant 0 : i32
    %c0_i32_0 = arith.constant 0 : i32
    %c0_i32_1 = arith.constant 0 : i32
    return %c0_i32, %c0_i32_0 : i32, i32
  }
  func.func @transform_6(%arg0: i32) -> (i32, i32) {
    %c0_i32 = arith.constant 0 : i32
    %c0_i32_0 = arith.constant 0 : i32
    %c0_i32_1 = arith.constant 0 : i32
    return %c0_i32, %c0_i32_0 : i32, i32
  }
  func.func @transform_7(%arg0: i32) -> (i32, i32) {
    %c0_i32 = arith.constant 0 : i32
    %c0_i32_0 = arith.constant 0 : i32
    return %arg0, %c0_i32 : i32, i32
  }
}

</mosaic_0001>

<bundles_post_ra>
// kernel: tpu_custom_call.1
= control target key start
LH: loop header
LB: loop body
LE: loop exit
PB: predicated region body
PF: predicated region fallthrough
CT: control target
= control target key end

     0   :  { %12 = vsyncpa [#allocation3], 0  ;;  %s1331_s0 = inlined_call_operand.hbm [shape: f32[8,128], index: 0, kind: input, shape index: {}]   ;;  %s1332_s1 = inlined_call_operand.hbm [shape: f32[128,512], index: 1, kind: input, shape index: {}]   ;;  %s1333_s2 = inlined_call_operand.hbm [shape: f32[1,512], index: 2, kind: input, shape index: {}]   ;;  %s1334_s3 = inlined_call_operand.hbm [shape: f32[512,512], index: 3, kind: input, shape index: {}]   ;;  %s1335_s4 = inlined_call_operand.hbm [shape: f32[1,512], index: 4, kind: input, shape index: {}]   ;;  %s1336_s5 = inlined_call_operand.hbm [shape: f32[512,128], index: 5, kind: input, shape index: {}]   ;;  %s1337_s6 = inlined_call_operand.vmem [shape: f32[1,128], index: 6, kind: input, shape index: {}]   ;;  %s1338_s7 = inlined_call_operand.hbm [shape: f32[8,128], index: 7, kind: output, shape index: {}]  }
   0x1   :  { %13 = vsyncpa [#allocation6], 0 }
   0x2   :  { %14 = vsyncpa [#allocation9], 0 }
   0x3   :  { %15 = vsyncpa [#allocation12], 0  ;;  %s32_s26 = sshll.u32 %s1332_s1, 4  ;;  %s33_s26 = int_to_ptr.hbm [resolvable:$true] %s32_s26 }
   0x4   :  { %16 = vsyncpa [#allocation4], 0  ;;  %s1226_s27 = smov [#allocation5]   ;;  %s56_s8 = sshll.u32 %s1334_s3, 4  ;;  %s57_s8 = int_to_ptr.hbm [resolvable:$true] %s56_s8 }
   0x5   :  { %s34_s28 = sshll.u32 %s1226_s27, 4  ;;  %s1227_s9 = smov 512   ;;  %s35_s28 = int_to_ptr.vmem [resolvable:$true] %s34_s28 }
   0x6   :  { %s1228_s10 = smov 32   ;;  %s1229_s11 = smov [#allocation8]  }
   0x7   :  { %40 = dma.hbm_to_vmem [thread:$0]  %s33_s26, 8192, %s35_s28, [#allocation6], %s1227_s9, %s1227_s9, %s1228_s10  }
   0x8   :  { %s58_s12 = sshll.u32 %s1229_s11, 4  ;;  %s22_s15 = sshll.u32 %s1331_s0, 4  ;;  %s59_s12 = int_to_ptr.vmem [resolvable:$true] %s58_s12  ;;  %s23_s15 = int_to_ptr.hbm [resolvable:$true] %s22_s15 }
   0x9   :  { %64 = dma.hbm_to_vmem [thread:$0]  %s57_s8, 32768, %s59_s12, [#allocation9], %s1227_s9, %s1227_s9, %s1228_s10  }
   0xa   :  { %s46_s17 = sshll.u32 %s1333_s2, 4  ;;  %s1230_s18 = smov [#allocation2]   ;;  %s47_s17 = int_to_ptr.hbm [resolvable:$true] %s46_s17 }
   0xb   :  { %s24_s19 = sshll.u32 %s1230_s18, 4  ;;  %s1231_s3 = smov [#allocation7]   ;;  %s25_s19 = int_to_ptr.vmem [resolvable:$true] %s24_s19 }
   0xc   :  { %27 = dma.hbm_to_vmem [thread:$0]  %s23_s15, 128, %s25_s19, [#allocation3]  }
   0xd   :  { %s48_s20 = sshll.u32 %s1231_s3, 4  ;;  %s70_s23 = sshll.u32 %s1335_s4, 4  ;;  %s49_s20 = int_to_ptr.vmem [resolvable:$true] %s48_s20  ;;  %s71_s23 = int_to_ptr.hbm [resolvable:$true] %s70_s23 }
   0xe   :  { %51 = dma.hbm_to_vmem [thread:$0]  %s47_s17, 64, %s49_s20, [#allocation6]  }
   0xf   :  { %s80_s25 = sshll.u32 %s1336_s5, 4  ;;  %s1232_s26 = smov [#allocation10]   ;;  %s81_s25 = int_to_ptr.hbm [resolvable:$true] %s80_s25 }
  0x10   :  { %s72_s2 = sshll.u32 %s1232_s26, 4  ;;  %s1233_s27 = smov [#allocation11]   ;;  %s73_s2 = int_to_ptr.vmem [resolvable:$true] %s72_s2 }
  0x11   :  { %75 = dma.hbm_to_vmem [thread:$0]  %s71_s23, 64, %s73_s2, [#allocation9]  }
  0x12   :  { %s82_s28 = sshll.u32 %s1233_s27, 4  ;;  %s1234_s29 = smov 128   ;;  %s83_s28 = int_to_ptr.vmem [resolvable:$true] %s82_s28 }
  0x13   :  { %s1235_s30 = smov 8  }
  0x14   :  { %88 = dma.hbm_to_vmem [thread:$0]  %s81_s25, 8192, %s83_s28, [#allocation12], %s1234_s29, %s1234_s29, %s1235_s30  }
  0x15   :  { %1216 = dma.done.wait [#allocation3], 128  }
  0x16   :  { %1217 = vsyncadd [#allocation3], 4294967168 }
  0x17   :  { %1218 = dma.done.wait [#allocation6], 8256  }
  0x18   :  { %1219 = vsyncadd [#allocation6], 4294959040 }
  0x19   :  { %1220 = dma.done.wait [#allocation9], 32832  }
  0x1a   :  { %1221 = vsyncadd [#allocation9], 4294934464 }
  0x1b   :  { %1222 = dma.done.wait [#allocation12], 8192  }
  0x1c   :  { %1223 = vsyncadd [#allocation12], 4294959104  ;;  %v176_v0 = vld [vmem:[#allocation5 + $0x1e0] sm:$0xff]  ;;  %v177_v1 = vld [vmem:[#allocation5 + $0x1e8] sm:$0xff]  ;;  %s1236_s8 = smov [#allocation13]   ;;  %s1021_s12 = sshll.u32 %s1338_s7, 4  ;;  %s1022_s12 = int_to_ptr.hbm [resolvable:$true] %s1021_s12 }
  0x1d   :  { %v178_v2 = vld [vmem:[#allocation5 + $0x1f0] sm:$0xff]  ;;  %190 = vmatpush.msra.mxu0 %v176_v0  ;;  %210 = vmatpush.msra.mxu1 %v177_v1  ;;  %v179_v3 = vld [vmem:[#allocation5 + $0x1f8] sm:$0xff]  ;;  %v172_v4 = vld [vmem:[#allocation5 + $0x1c0] sm:$0xff]  ;;  %s1019_s9 = sshll.u32 %s1236_s8, 4  ;;  %s1020_s9 = int_to_ptr.vmem [resolvable:$true] %s1019_s9 }
  0x1e   :  { %v173_v5 = vld [vmem:[#allocation5 + $0x1c8] sm:$0xff]  ;;  %230 = vmatpush.msra.mxu2 %v178_v2  ;;  %250 = vmatpush.msra.mxu3 %v179_v3  ;;  %v174_v6 = vld [vmem:[#allocation5 + $0x1d0] sm:$0xff]  ;;  %v175_v7 = vld [vmem:[#allocation5 + $0x1d8] sm:$0xff] }
  0x1f   :  { %v168_v8 = vld [vmem:[#allocation5 + $0x1a0] sm:$0xff]  ;;  %191 = vmatpush.msra.mxu0 %v172_v4  ;;  %211 = vmatpush.msra.mxu1 %v173_v5  ;;  %v169_v9 = vld [vmem:[#allocation5 + $0x1a8] sm:$0xff]  ;;  %v170_v10 = vld [vmem:[#allocation5 + $0x1b0] sm:$0xff] }
  0x20   :  { %v171_v11 = vld [vmem:[#allocation5 + $0x1b8] sm:$0xff]  ;;  %231 = vmatpush.msra.mxu2 %v174_v6  ;;  %251 = vmatpush.msra.mxu3 %v175_v7  ;;  %v164_v12 = vld [vmem:[#allocation5 + $0x180] sm:$0xff]  ;;  %v165_v13 = vld [vmem:[#allocation5 + $0x188] sm:$0xff] }
  0x21   :  { %192 = vmatpush.msra.mxu0 %v168_v8  ;;  %212 = vmatpush.msra.mxu1 %v169_v9  ;;  %v166_v14 = vld [vmem:[#allocation5 + $0x190] sm:$0xff]  ;;  %v167_v15 = vld [vmem:[#allocation5 + $0x198] sm:$0xff]  ;;  %v160_v16 = vld [vmem:[#allocation5 + $0x160] sm:$0xff] }
  0x22   :  { %232 = vmatpush.msra.mxu2 %v170_v10  ;;  %252 = vmatpush.msra.mxu3 %v171_v11  ;;  %v161_v17 = vld [vmem:[#allocation5 + $0x168] sm:$0xff]  ;;  %v162_v18 = vld [vmem:[#allocation5 + $0x170] sm:$0xff]  ;;  %v163_v19 = vld [vmem:[#allocation5 + $0x178] sm:$0xff] }
  0x23   :  { %193 = vmatpush.msra.mxu0 %v164_v12  ;;  %213 = vmatpush.msra.mxu1 %v165_v13  ;;  %v156_v20 = vld [vmem:[#allocation5 + $0x140] sm:$0xff]  ;;  %v157_v21 = vld [vmem:[#allocation5 + $0x148] sm:$0xff]  ;;  %v158_v22 = vld [vmem:[#allocation5 + $0x150] sm:$0xff] }
  0x24   :  { %233 = vmatpush.msra.mxu2 %v166_v14  ;;  %253 = vmatpush.msra.mxu3 %v167_v15  ;;  %v159_v23 = vld [vmem:[#allocation5 + $0x158] sm:$0xff]  ;;  %v152_v24 = vld [vmem:[#allocation5 + $0x120] sm:$0xff]  ;;  %v153_v25 = vld [vmem:[#allocation5 + $0x128] sm:$0xff] }
  0x25   :  { %194 = vmatpush.msra.mxu0 %v160_v16  ;;  %214 = vmatpush.msra.mxu1 %v161_v17  ;;  %v154_v26 = vld [vmem:[#allocation5 + $0x130] sm:$0xff]  ;;  %v155_v27 = vld [vmem:[#allocation5 + $0x138] sm:$0xff]  ;;  %v148_v28 = vld [vmem:[#allocation5 + $0x100] sm:$0xff] }
  0x26   :  { %234 = vmatpush.msra.mxu2 %v162_v18  ;;  %254 = vmatpush.msra.mxu3 %v163_v19  ;;  %v149_v29 = vld [vmem:[#allocation5 + $0x108] sm:$0xff]  ;;  %v150_v30 = vld [vmem:[#allocation5 + $0x110] sm:$0xff]  ;;  %v151_v31 = vld [vmem:[#allocation5 + $0x118] sm:$0xff] }
  0x27   :  { %195 = vmatpush.msra.mxu0 %v156_v20  ;;  %215 = vmatpush.msra.mxu1 %v157_v21  ;;  %v144_v32 = vld [vmem:[#allocation5 + $0xe0] sm:$0xff]  ;;  %v145_v33 = vld [vmem:[#allocation5 + $0xe8] sm:$0xff]  ;;  %v146_v34 = vld [vmem:[#allocation5 + $0xf0] sm:$0xff] }
  0x28   :  { %235 = vmatpush.msra.mxu2 %v158_v22  ;;  %255 = vmatpush.msra.mxu3 %v159_v23  ;;  %v147_v35 = vld [vmem:[#allocation5 + $0xf8] sm:$0xff]  ;;  %v140_v36 = vld [vmem:[#allocation5 + $0xc0] sm:$0xff]  ;;  %v141_v37 = vld [vmem:[#allocation5 + $0xc8] sm:$0xff] }
  0x29   :  { %196 = vmatpush.msra.mxu0 %v152_v24  ;;  %216 = vmatpush.msra.mxu1 %v153_v25  ;;  %v142_v38 = vld [vmem:[#allocation5 + $0xd0] sm:$0xff]  ;;  %v143_v39 = vld [vmem:[#allocation5 + $0xd8] sm:$0xff]  ;;  %v136_v40 = vld [vmem:[#allocation5 + $0xa0] sm:$0xff] }
  0x2a   :  { %236 = vmatpush.msra.mxu2 %v154_v26  ;;  %256 = vmatpush.msra.mxu3 %v155_v27  ;;  %v137_v41 = vld [vmem:[#allocation5 + $0xa8] sm:$0xff]  ;;  %v138_v42 = vld [vmem:[#allocation5 + $0xb0] sm:$0xff]  ;;  %v139_v43 = vld [vmem:[#allocation5 + $0xb8] sm:$0xff] }
  0x2b   :  { %197 = vmatpush.msra.mxu0 %v148_v28  ;;  %217 = vmatpush.msra.mxu1 %v149_v29  ;;  %v132_v44 = vld [vmem:[#allocation5 + $0x80] sm:$0xff]  ;;  %v133_v45 = vld [vmem:[#allocation5 + $0x88] sm:$0xff]  ;;  %v134_v46 = vld [vmem:[#allocation5 + $0x90] sm:$0xff] }
  0x2c   :  { %237 = vmatpush.msra.mxu2 %v150_v30  ;;  %257 = vmatpush.msra.mxu3 %v151_v31  ;;  %v135_v47 = vld [vmem:[#allocation5 + $0x98] sm:$0xff]  ;;  %v128_v48 = vld [vmem:[#allocation5 + $0x60] sm:$0xff]  ;;  %v129_v49 = vld [vmem:[#allocation5 + $0x68] sm:$0xff] }
  0x2d   :  { %198 = vmatpush.msra.mxu0 %v144_v32  ;;  %218 = vmatpush.msra.mxu1 %v145_v33  ;;  %v130_v50 = vld [vmem:[#allocation5 + $0x70] sm:$0xff]  ;;  %v131_v51 = vld [vmem:[#allocation5 + $0x78] sm:$0xff]  ;;  %v124_v52 = vld [vmem:[#allocation5 + $0x40] sm:$0xff] }
  0x2e   :  { %238 = vmatpush.msra.mxu2 %v146_v34  ;;  %258 = vmatpush.msra.mxu3 %v147_v35  ;;  %v125_v53 = vld [vmem:[#allocation5 + $0x48] sm:$0xff]  ;;  %v126_v54 = vld [vmem:[#allocation5 + $0x50] sm:$0xff]  ;;  %v127_v55 = vld [vmem:[#allocation5 + $0x58] sm:$0xff] }
  0x2f   :  { %199 = vmatpush.msra.mxu0 %v140_v36  ;;  %219 = vmatpush.msra.mxu1 %v141_v37  ;;  %v120_v56 = vld [vmem:[#allocation5 + $0x20] sm:$0xff]  ;;  %v121_v57 = vld [vmem:[#allocation5 + $0x28] sm:$0xff]  ;;  %v122_v58 = vld [vmem:[#allocation5 + $0x30] sm:$0xff] }
  0x30   :  { %239 = vmatpush.msra.mxu2 %v142_v38  ;;  %259 = vmatpush.msra.mxu3 %v143_v39  ;;  %v123_v59 = vld [vmem:[#allocation5 + $0x38] sm:$0xff]  ;;  %v116_v60 = vld [vmem:[#allocation5] sm:$0xff]  ;;  %v117_v61 = vld [vmem:[#allocation5 + $0x8] sm:$0xff] }
  0x31   :  { %200 = vmatpush.msra.mxu0 %v136_v40  ;;  %220 = vmatpush.msra.mxu1 %v137_v41  ;;  %v118_v62 = vld [vmem:[#allocation5 + $0x10] sm:$0xff]  ;;  %v119_v63 = vld [vmem:[#allocation5 + $0x18] sm:$0xff]  ;;  %v334_v1 = vld [vmem:[#allocation8 + $0x1e0] sm:$0xff] }
  0x32   :  { %240 = vmatpush.msra.mxu2 %v138_v42  ;;  %260 = vmatpush.msra.mxu3 %v139_v43  ;;  %v115_v0 = vld [vmem:[#allocation2] sm:$0xff]  ;;  %v398_v2 = vld [vmem:[#allocation8 + $0x3e0] sm:$0xff] }
  0x33   :  { %201 = vmatpush.msra.mxu0 %v132_v44  ;;  %221 = vmatpush.msra.mxu1 %v133_v45  ;;  %v462_v3 = vld [vmem:[#allocation8 + $0x5e0] sm:$0xff] }
  0x34   :  { %241 = vmatpush.msra.mxu2 %v134_v46  ;;  %261 = vmatpush.msra.mxu3 %v135_v47  ;;  %v526_v4 = vld [vmem:[#allocation8 + $0x7e0] sm:$0xff] }
  0x35   :  { %202 = vmatpush.msra.mxu0 %v128_v48  ;;  %222 = vmatpush.msra.mxu1 %v129_v49  ;;  %v330_v5 = vld [vmem:[#allocation8 + $0x1c0] sm:$0xff] }
  0x36   :  { %242 = vmatpush.msra.mxu2 %v130_v50  ;;  %262 = vmatpush.msra.mxu3 %v131_v51  ;;  %v394_v6 = vld [vmem:[#allocation8 + $0x3c0] sm:$0xff] }
  0x37   :  { %203 = vmatpush.msra.mxu0 %v124_v52  ;;  %223 = vmatpush.msra.mxu1 %v125_v53  ;;  %v458_v7 = vld [vmem:[#allocation8 + $0x5c0] sm:$0xff] }
  0x38   :  { %243 = vmatpush.msra.mxu2 %v126_v54  ;;  %263 = vmatpush.msra.mxu3 %v127_v55  ;;  %v522_v8 = vld [vmem:[#allocation8 + $0x7c0] sm:$0xff] }
  0x39   :  { %204 = vmatpush.msra.mxu0 %v120_v56  ;;  %224 = vmatpush.msra.mxu1 %v121_v57  ;;  %v326_v9 = vld [vmem:[#allocation8 + $0x1a0] sm:$0xff] }
  0x3a   :  { %244 = vmatpush.msra.mxu2 %v122_v58  ;;  %264 = vmatpush.msra.mxu3 %v123_v59  ;;  %v390_v10 = vld [vmem:[#allocation8 + $0x3a0] sm:$0xff] }
  0x3b   :  { %205 = vmatpush.msra.mxu0 %v116_v60  ;;  %225 = vmatpush.msra.mxu1 %v117_v61  ;;  %v454_v11 = vld [vmem:[#allocation8 + $0x5a0] sm:$0xff] }
  0x3c   :  { %245 = vmatpush.msra.mxu2 %v118_v62  ;;  %265 = vmatpush.msra.mxu3 %v119_v63  ;;  %v518_v12 = vld [vmem:[#allocation8 + $0x7a0] sm:$0xff]  ;;  %v335_v63 = vld [vmem:[#allocation8 + $0x1e8] sm:$0xff] }
  0x3d   :  { %206 = vmatmul.f32.vlgmr.msra.gmra.mxu0 %v115_v0  ;;  %226 = vmatmul.f32.vlgmr.msra.gmra.mxu1 %v115_v0  ;;  %v322_v13 = vld [vmem:[#allocation8 + $0x180] sm:$0xff] }
  0x3e   :  { %246 = vmatmul.f32.vlgmr.msra.gmra.mxu2 %v115_v0  ;;  %266 = vmatmul.f32.vlgmr.msra.gmra.mxu3 %v115_v0  ;;  %v386_v14 = vld [vmem:[#allocation8 + $0x380] sm:$0xff]  ;;  %v399_v0 = vld [vmem:[#allocation8 + $0x3e8] sm:$0xff] }
  0x3f   :  { %540 = vmatpush.msrb.mxu0 %v334_v1  ;;  %560 = vmatpush.msrb.mxu1 %v398_v2  ;;  %v450_v15 = vld [vmem:[#allocation8 + $0x580] sm:$0xff] }
  0x40   :  { %580 = vmatpush.msrb.mxu2 %v462_v3  ;;  %600 = vmatpush.msrb.mxu3 %v526_v4  ;;  %v514_v16 = vld [vmem:[#allocation8 + $0x780] sm:$0xff]  ;;  %v331_v3 = vld [vmem:[#allocation8 + $0x1c8] sm:$0xff] }
  0x41   :  { %541 = vmatpush.msrb.mxu0 %v330_v5  ;;  %561 = vmatpush.msrb.mxu1 %v394_v6  ;;  %v318_v17 = vld [vmem:[#allocation8 + $0x160] sm:$0xff]  ;;  %v395_v4 = vld [vmem:[#allocation8 + $0x3c8] sm:$0xff] }
  0x42   :  { %581 = vmatpush.msrb.mxu2 %v458_v7  ;;  %601 = vmatpush.msrb.mxu3 %v522_v8  ;;  %v382_v18 = vld [vmem:[#allocation8 + $0x360] sm:$0xff]  ;;  %v463_v5 = vld [vmem:[#allocation8 + $0x5e8] sm:$0xff] }
  0x43   :  { %542 = vmatpush.msrb.mxu0 %v326_v9  ;;  %562 = vmatpush.msrb.mxu1 %v390_v10  ;;  %v446_v19 = vld [vmem:[#allocation8 + $0x560] sm:$0xff]  ;;  %v527_v6 = vld [vmem:[#allocation8 + $0x7e8] sm:$0xff] }
  0x44   :  { %582 = vmatpush.msrb.mxu2 %v454_v11  ;;  %602 = vmatpush.msrb.mxu3 %v518_v12  ;;  %v510_v20 = vld [vmem:[#allocation8 + $0x760] sm:$0xff]  ;;  %v327_v7 = vld [vmem:[#allocation8 + $0x1a8] sm:$0xff] }
  0x45   :  { %543 = vmatpush.msrb.mxu0 %v322_v13  ;;  %563 = vmatpush.msrb.mxu1 %v386_v14  ;;  %v314_v21 = vld [vmem:[#allocation8 + $0x140] sm:$0xff]  ;;  %v391_v8 = vld [vmem:[#allocation8 + $0x3a8] sm:$0xff] }
  0x46   :  { %v378_v22 = vld [vmem:[#allocation8 + $0x340] sm:$0xff]  ;;  %583 = vmatpush.msrb.mxu2 %v450_v15  ;;  %603 = vmatpush.msrb.mxu3 %v514_v16  ;;  %v459_v9 = vld [vmem:[#allocation8 + $0x5c8] sm:$0xff] }
  0x47   :  { %544 = vmatpush.msrb.mxu0 %v318_v17  ;;  %564 = vmatpush.msrb.mxu1 %v382_v18  ;;  %v442_v23 = vld [vmem:[#allocation8 + $0x540] sm:$0xff]  ;;  %v523_v10 = vld [vmem:[#allocation8 + $0x7c8] sm:$0xff] }
  0x48   :  { %v506_v24 = vld [vmem:[#allocation8 + $0x740] sm:$0xff]  ;;  %584 = vmatpush.msrb.mxu2 %v446_v19  ;;  %604 = vmatpush.msrb.mxu3 %v510_v20  ;;  %v323_v11 = vld [vmem:[#allocation8 + $0x188] sm:$0xff] }
  0x49   :  { %v310_v25 = vld [vmem:[#allocation8 + $0x120] sm:$0xff]  ;;  %545 = vmatpush.msrb.mxu0 %v314_v21  ;;  %565 = vmatpush.msrb.mxu1 %v378_v22  ;;  %v387_v12 = vld [vmem:[#allocation8 + $0x388] sm:$0xff] }
  0x4a   :  { %v374_v26 = vld [vmem:[#allocation8 + $0x320] sm:$0xff]  ;;  %585 = vmatpush.msrb.mxu2 %v442_v23  ;;  %605 = vmatpush.msrb.mxu3 %v506_v24  ;;  %v455_v13 = vld [vmem:[#allocation8 + $0x5a8] sm:$0xff] }
  0x4b   :  { %v438_v27 = vld [vmem:[#allocation8 + $0x520] sm:$0xff]  ;;  %546 = vmatpush.msrb.mxu0 %v310_v25  ;;  %566 = vmatpush.msrb.mxu1 %v374_v26  ;;  %v519_v14 = vld [vmem:[#allocation8 + $0x7a8] sm:$0xff] }
  0x4c   :  { %v502_v28 = vld [vmem:[#allocation8 + $0x720] sm:$0xff]  ;;  %586 = vmatpush.msrb.mxu2 %v438_v27  ;;  %v319_v15 = vld [vmem:[#allocation8 + $0x168] sm:$0xff] }
  0x4d   :  { %v306_v29 = vld [vmem:[#allocation8 + $0x100] sm:$0xff]  ;;  %606 = vmatpush.msrb.mxu3 %v502_v28  ;;  %v383_v16 = vld [vmem:[#allocation8 + $0x368] sm:$0xff] }
  0x4e   :  { %v370_v30 = vld [vmem:[#allocation8 + $0x300] sm:$0xff]  ;;  %547 = vmatpush.msrb.mxu0 %v306_v29  ;;  %v451_v17 = vld [vmem:[#allocation8 + $0x588] sm:$0xff] }
  0x4f   :  { %v434_v31 = vld [vmem:[#allocation8 + $0x500] sm:$0xff]  ;;  %567 = vmatpush.msrb.mxu1 %v370_v30  ;;  %v515_v18 = vld [vmem:[#allocation8 + $0x788] sm:$0xff] }
  0x50   :  { %v498_v32 = vld [vmem:[#allocation8 + $0x700] sm:$0xff]  ;;  %587 = vmatpush.msrb.mxu2 %v434_v31  ;;  %v315_v19 = vld [vmem:[#allocation8 + $0x148] sm:$0xff] }
  0x51   :  { %v302_v33 = vld [vmem:[#allocation8 + $0xe0] sm:$0xff]  ;;  %607 = vmatpush.msrb.mxu3 %v498_v32  ;;  %v379_v20 = vld [vmem:[#allocation8 + $0x348] sm:$0xff] }
  0x52   :  { %v366_v34 = vld [vmem:[#allocation8 + $0x2e0] sm:$0xff]  ;;  %548 = vmatpush.msrb.mxu0 %v302_v33  ;;  %v447_v21 = vld [vmem:[#allocation8 + $0x568] sm:$0xff] }
  0x53   :  { %v430_v35 = vld [vmem:[#allocation8 + $0x4e0] sm:$0xff]  ;;  %568 = vmatpush.msrb.mxu1 %v366_v34  ;;  %v511_v22 = vld [vmem:[#allocation8 + $0x768] sm:$0xff] }
  0x54   :  { %v494_v36 = vld [vmem:[#allocation8 + $0x6e0] sm:$0xff]  ;;  %588 = vmatpush.msrb.mxu2 %v430_v35  ;;  %v311_v23 = vld [vmem:[#allocation8 + $0x128] sm:$0xff] }
  0x55   :  { %v298_v37 = vld [vmem:[#allocation8 + $0xc0] sm:$0xff]  ;;  %608 = vmatpush.msrb.mxu3 %v494_v36  ;;  %v375_v24 = vld [vmem:[#allocation8 + $0x328] sm:$0xff] }
  0x56   :  { %v362_v38 = vld [vmem:[#allocation8 + $0x2c0] sm:$0xff]  ;;  %549 = vmatpush.msrb.mxu0 %v298_v37  ;;  %v443_v25 = vld [vmem:[#allocation8 + $0x548] sm:$0xff] }
  0x57   :  { %v426_v39 = vld [vmem:[#allocation8 + $0x4c0] sm:$0xff]  ;;  %569 = vmatpush.msrb.mxu1 %v362_v38  ;;  %v507_v26 = vld [vmem:[#allocation8 + $0x748] sm:$0xff] }
  0x58   :  { %v490_v40 = vld [vmem:[#allocation8 + $0x6c0] sm:$0xff]  ;;  %589 = vmatpush.msrb.mxu2 %v426_v39  ;;  %v307_v27 = vld [vmem:[#allocation8 + $0x108] sm:$0xff] }
  0x59   :  { %v294_v41 = vld [vmem:[#allocation8 + $0xa0] sm:$0xff]  ;;  %609 = vmatpush.msrb.mxu3 %v490_v40  ;;  %v371_v28 = vld [vmem:[#allocation8 + $0x308] sm:$0xff] }
  0x5a   :  { %v358_v42 = vld [vmem:[#allocation8 + $0x2a0] sm:$0xff]  ;;  %550 = vmatpush.msrb.mxu0 %v294_v41  ;;  %v439_v29 = vld [vmem:[#allocation8 + $0x528] sm:$0xff] }
  0x5b   :  { %v422_v43 = vld [vmem:[#allocation8 + $0x4a0] sm:$0xff]  ;;  %570 = vmatpush.msrb.mxu1 %v358_v42  ;;  %v503_v30 = vld [vmem:[#allocation8 + $0x728] sm:$0xff] }
  0x5c   :  { %v486_v44 = vld [vmem:[#allocation8 + $0x6a0] sm:$0xff]  ;;  %590 = vmatpush.msrb.mxu2 %v422_v43  ;;  %v303_v31 = vld [vmem:[#allocation8 + $0xe8] sm:$0xff] }
  0x5d   :  { %v290_v45 = vld [vmem:[#allocation8 + $0x80] sm:$0xff]  ;;  %610 = vmatpush.msrb.mxu3 %v486_v44  ;;  %v367_v32 = vld [vmem:[#allocation8 + $0x2e8] sm:$0xff] }
  0x5e   :  { %v354_v46 = vld [vmem:[#allocation8 + $0x280] sm:$0xff]  ;;  %551 = vmatpush.msrb.mxu0 %v290_v45  ;;  %v435_v33 = vld [vmem:[#allocation8 + $0x508] sm:$0xff] }
  0x5f   :  { %v418_v47 = vld [vmem:[#allocation8 + $0x480] sm:$0xff]  ;;  %571 = vmatpush.msrb.mxu1 %v354_v46  ;;  %v499_v34 = vld [vmem:[#allocation8 + $0x708] sm:$0xff] }
  0x60   :  { %v482_v48 = vld [vmem:[#allocation8 + $0x680] sm:$0xff]  ;;  %591 = vmatpush.msrb.mxu2 %v418_v47  ;;  %v299_v35 = vld [vmem:[#allocation8 + $0xc8] sm:$0xff] }
  0x61   :  { %v286_v49 = vld [vmem:[#allocation8 + $0x60] sm:$0xff]  ;;  %611 = vmatpush.msrb.mxu3 %v482_v48  ;;  %v363_v36 = vld [vmem:[#allocation8 + $0x2c8] sm:$0xff] }
  0x62   :  { %v350_v50 = vld [vmem:[#allocation8 + $0x260] sm:$0xff]  ;;  %552 = vmatpush.msrb.mxu0 %v286_v49  ;;  %v431_v37 = vld [vmem:[#allocation8 + $0x4e8] sm:$0xff] }
  0x63   :  { %v414_v51 = vld [vmem:[#allocation8 + $0x460] sm:$0xff]  ;;  %572 = vmatpush.msrb.mxu1 %v350_v50  ;;  %v495_v38 = vld [vmem:[#allocation8 + $0x6e8] sm:$0xff] }
  0x64   :  { %v478_v52 = vld [vmem:[#allocation8 + $0x660] sm:$0xff]  ;;  %592 = vmatpush.msrb.mxu2 %v414_v51  ;;  %v295_v39 = vld [vmem:[#allocation8 + $0xa8] sm:$0xff] }
  0x65   :  { %v282_v53 = vld [vmem:[#allocation8 + $0x40] sm:$0xff]  ;;  %612 = vmatpush.msrb.mxu3 %v478_v52  ;;  %v359_v40 = vld [vmem:[#allocation8 + $0x2a8] sm:$0xff] }
  0x66   :  { %v346_v54 = vld [vmem:[#allocation8 + $0x240] sm:$0xff]  ;;  %553 = vmatpush.msrb.mxu0 %v282_v53  ;;  %v427_v41 = vld [vmem:[#allocation8 + $0x4c8] sm:$0xff] }
  0x67   :  { %v410_v55 = vld [vmem:[#allocation8 + $0x440] sm:$0xff]  ;;  %573 = vmatpush.msrb.mxu1 %v346_v54  ;;  %v491_v42 = vld [vmem:[#allocation8 + $0x6c8] sm:$0xff] }
  0x68   :  { %v474_v56 = vld [vmem:[#allocation8 + $0x640] sm:$0xff]  ;;  %593 = vmatpush.msrb.mxu2 %v410_v55  ;;  %v291_v43 = vld [vmem:[#allocation8 + $0x88] sm:$0xff] }
  0x69   :  { %v278_v57 = vld [vmem:[#allocation8 + $0x20] sm:$0xff]  ;;  %613 = vmatpush.msrb.mxu3 %v474_v56  ;;  %v355_v44 = vld [vmem:[#allocation8 + $0x288] sm:$0xff] }
  0x6a   :  { %v342_v58 = vld [vmem:[#allocation8 + $0x220] sm:$0xff]  ;;  %554 = vmatpush.msrb.mxu0 %v278_v57  ;;  %v287_v45 = vld [vmem:[#allocation8 + $0x68] sm:$0xff] }
  0x6b   :  { %v406_v59 = vld [vmem:[#allocation8 + $0x420] sm:$0xff]  ;;  %574 = vmatpush.msrb.mxu1 %v342_v58  ;;  %v351_v46 = vld [vmem:[#allocation8 + $0x268] sm:$0xff] }
  0x6c   :  { %v470_v60 = vld [vmem:[#allocation8 + $0x620] sm:$0xff]  ;;  %594 = vmatpush.msrb.mxu2 %v406_v59  ;;  %v283_v47 = vld [vmem:[#allocation8 + $0x48] sm:$0xff] }
  0x6d   :  { %v274_v61 = vld [vmem:[#allocation8] sm:$0xff]  ;;  %614 = vmatpush.msrb.mxu3 %v470_v60  ;;  %v347_v48 = vld [vmem:[#allocation8 + $0x248] sm:$0xff] }
  0x6e   :  { %v338_v62 = vld [vmem:[#allocation8 + $0x200] sm:$0xff]  ;;  %555 = vmatpush.msrb.mxu0 %v274_v61  ;;  %v423_v49 = vld [vmem:[#allocation8 + $0x4a8] sm:$0xff] }
  0x6f   :  { %v402_v1 = vld [vmem:[#allocation8 + $0x400] sm:$0xff]  ;;  %575 = vmatpush.msrb.mxu1 %v338_v62  ;;  %v487_v50 = vld [vmem:[#allocation8 + $0x6a8] sm:$0xff] }
  0x70   :  { %v466_v2 = vld [vmem:[#allocation8 + $0x600] sm:$0xff]  ;;  %620 = vmatpush.msra.mxu0 %v335_v63  ;;  %595 = vmatpush.msrb.mxu2 %v402_v1  ;;  %v279_v51 = vld [vmem:[#allocation8 + $0x28] sm:$0xff]  ;;  %v180_v1 = vld [vmem:[#allocation7] sm:$0xf] }
  0x71   :  { %640 = vmatpush.msra.mxu1 %v399_v0  ;;  %615 = vmatpush.msrb.mxu3 %v466_v2  ;;  %v343_v52 = vld [vmem:[#allocation8 + $0x228] sm:$0xff]  ;;  %v182_v2 = vperm.slane %v180_v1, 0 }
  0x72   :  { %621 = vmatpush.msra.mxu0 %v331_v3  ;;  %660 = vmatpush.msra.mxu2 %v463_v5  ;;  %v419_v53 = vld [vmem:[#allocation8 + $0x488] sm:$0xff]  ;;  %v183_v3 = vperm.slane %v180_v1, 1 }
  0x73   :  { %641 = vmatpush.msra.mxu1 %v395_v4  ;;  %680 = vmatpush.msra.mxu3 %v527_v6  ;;  %v483_v54 = vld [vmem:[#allocation8 + $0x688] sm:$0xff] }
  0x74   :  { %622 = vmatpush.msra.mxu0 %v327_v7  ;;  %661 = vmatpush.msra.mxu2 %v459_v9  ;;  %v275_v55 = vld [vmem:[#allocation8 + $0x8] sm:$0xff] }
  0x75   :  { %642 = vmatpush.msra.mxu1 %v391_v8  ;;  %681 = vmatpush.msra.mxu3 %v523_v10  ;;  %v339_v56 = vld [vmem:[#allocation8 + $0x208] sm:$0xff]  ;;  %v336_v10 = vld [vmem:[#allocation8 + $0x1f0] sm:$0xff] }
  0x76   :  { %623 = vmatpush.msra.mxu0 %v323_v11  ;;  %662 = vmatpush.msra.mxu2 %v455_v13  ;;  %v415_v57 = vld [vmem:[#allocation8 + $0x468] sm:$0xff]  ;;  %v400_v11 = vld [vmem:[#allocation8 + $0x3f0] sm:$0xff]  ;;  %v185_v13 = vperm.slane %v180_v1, 3 }
  0x77   :  { %643 = vmatpush.msra.mxu1 %v387_v12  ;;  %682 = vmatpush.msra.mxu3 %v519_v14  ;;  %v479_v58 = vld [vmem:[#allocation8 + $0x668] sm:$0xff]  ;;  %v184_v12 = vperm.slane %v180_v1, 2  ;;  %v332_v14 = vld [vmem:[#allocation8 + $0x1d0] sm:$0xff] }
  0x78   :  { %624 = vmatpush.msra.mxu0 %v319_v15  ;;  %663 = vmatpush.msra.mxu2 %v451_v17  ;;  %v411_v59 = vld [vmem:[#allocation8 + $0x448] sm:$0xff]  ;;  %v396_v15 = vld [vmem:[#allocation8 + $0x3d0] sm:$0xff] }
  0x79   :  { %644 = vmatpush.msra.mxu1 %v383_v16  ;;  %683 = vmatpush.msra.mxu3 %v515_v18  ;;  %v475_v60 = vld [vmem:[#allocation8 + $0x648] sm:$0xff]  ;;  %v328_v18 = vld [vmem:[#allocation8 + $0x1b0] sm:$0xff] }
  0x7a   :  { %625 = vmatpush.msra.mxu0 %v315_v19  ;;  %664 = vmatpush.msra.mxu2 %v447_v21  ;;  %v407_v61 = vld [vmem:[#allocation8 + $0x428] sm:$0xff]  ;;  %v392_v19 = vld [vmem:[#allocation8 + $0x3b0] sm:$0xff] }
  0x7b   :  { %645 = vmatpush.msra.mxu1 %v379_v20  ;;  %684 = vmatpush.msra.mxu3 %v511_v22  ;;  %v471_v62 = vld [vmem:[#allocation8 + $0x628] sm:$0xff]  ;;  %v348_v1 = vld [vmem:[#allocation8 + $0x250] sm:$0xff] }
  0x7c   :  { %626 = vmatpush.msra.mxu0 %v311_v23  ;;  %665 = vmatpush.msra.mxu2 %v443_v25  ;;  %v403_v63 = vld [vmem:[#allocation8 + $0x408] sm:$0xff]  ;;  %v388_v25 = vld [vmem:[#allocation8 + $0x390] sm:$0xff] }
  0x7d   :  { %646 = vmatpush.msra.mxu1 %v375_v24  ;;  %685 = vmatpush.msra.mxu3 %v507_v26  ;;  %v467_v0 = vld [vmem:[#allocation8 + $0x608] sm:$0xff]  ;;  %v324_v24 = vld [vmem:[#allocation8 + $0x190] sm:$0xff] }
  0x7e   :  { %627 = vmatpush.msra.mxu0 %v307_v27  ;;  %666 = vmatpush.msra.mxu2 %v439_v29  ;;  %v464_v26 = vld [vmem:[#allocation8 + $0x5f0] sm:$0xff] }
  0x7f   :  { %647 = vmatpush.msra.mxu1 %v371_v28  ;;  %686 = vmatpush.msra.mxu3 %v503_v30  ;;  %v528_v27 = vld [vmem:[#allocation8 + $0x7f0] sm:$0xff] }
  0x80   :  { %628 = vmatpush.msra.mxu0 %v303_v31  ;;  %667 = vmatpush.msra.mxu2 %v435_v33  ;;  %v384_v28 = vld [vmem:[#allocation8 + $0x370] sm:$0xff] }
  0x81   :  { %648 = vmatpush.msra.mxu1 %v367_v32  ;;  %687 = vmatpush.msra.mxu3 %v499_v34  ;;  %v320_v29 = vld [vmem:[#allocation8 + $0x170] sm:$0xff] }
  0x82   :  { %629 = vmatpush.msra.mxu0 %v299_v35  ;;  %668 = vmatpush.msra.mxu2 %v431_v37  ;;  %v460_v30 = vld [vmem:[#allocation8 + $0x5d0] sm:$0xff] }
  0x83   :  { %649 = vmatpush.msra.mxu1 %v363_v36  ;;  %688 = vmatpush.msra.mxu3 %v495_v38  ;;  %v524_v31 = vld [vmem:[#allocation8 + $0x7d0] sm:$0xff] }
  0x84   :  { %630 = vmatpush.msra.mxu0 %v295_v39  ;;  %669 = vmatpush.msra.mxu2 %v427_v41  ;;  %v316_v32 = vld [vmem:[#allocation8 + $0x150] sm:$0xff] }
  0x85   :  { %650 = vmatpush.msra.mxu1 %v359_v40  ;;  %689 = vmatpush.msra.mxu3 %v491_v42  ;;  %v380_v33 = vld [vmem:[#allocation8 + $0x350] sm:$0xff] }
  0x86   :  { %631 = vmatpush.msra.mxu0 %v291_v43  ;;  %670 = vmatpush.msra.mxu2 %v423_v49  ;;  %v456_v34 = vld [vmem:[#allocation8 + $0x5b0] sm:$0xff] }
  0x87   :  { %651 = vmatpush.msra.mxu1 %v355_v44  ;;  %690 = vmatpush.msra.mxu3 %v487_v50  ;;  %v520_v35 = vld [vmem:[#allocation8 + $0x7b0] sm:$0xff] }
  0x88   :  { %632 = vmatpush.msra.mxu0 %v287_v45  ;;  %671 = vmatpush.msra.mxu2 %v419_v53  ;;  %v312_v36 = vld [vmem:[#allocation8 + $0x130] sm:$0xff] }
  0x89   :  { %652 = vmatpush.msra.mxu1 %v351_v46  ;;  %691 = vmatpush.msra.mxu3 %v483_v54  ;;  %v376_v37 = vld [vmem:[#allocation8 + $0x330] sm:$0xff] }
  0x8a   :  { %633 = vmatpush.msra.mxu0 %v283_v47  ;;  %672 = vmatpush.msra.mxu2 %v415_v57  ;;  %v452_v38 = vld [vmem:[#allocation8 + $0x590] sm:$0xff] }
  0x8b   :  { %653 = vmatpush.msra.mxu1 %v347_v48  ;;  %692 = vmatpush.msra.mxu3 %v479_v58  ;;  %v516_v39 = vld [vmem:[#allocation8 + $0x790] sm:$0xff] }
  0x8c   :  { %634 = vmatpush.msra.mxu0 %v279_v51  ;;  %673 = vmatpush.msra.mxu2 %v411_v59  ;;  %v308_v40 = vld [vmem:[#allocation8 + $0x110] sm:$0xff] }
  0x8d   :  { %654 = vmatpush.msra.mxu1 %v343_v52  ;;  %693 = vmatpush.msra.mxu3 %v475_v60  ;;  %v372_v41 = vld [vmem:[#allocation8 + $0x310] sm:$0xff] }
  0x8e   :  { %635 = vmatpush.msra.mxu0 %v275_v55  ;;  %674 = vmatpush.msra.mxu2 %v407_v61  ;;  %v448_v42 = vld [vmem:[#allocation8 + $0x570] sm:$0xff] }
  0x8f   :  { %655 = vmatpush.msra.mxu1 %v339_v56  ;;  %694 = vmatpush.msra.mxu3 %v471_v62  ;;  %v512_v43 = vld [vmem:[#allocation8 + $0x770] sm:$0xff] }
  0x90   :  { %675 = vmatpush.msra.mxu2 %v403_v63  ;;  %v304_v44 = vld [vmem:[#allocation8 + $0xf0] sm:$0xff] }
  0x91   :  { %695 = vmatpush.msra.mxu3 %v467_v0  ;;  %v368_v45 = vld [vmem:[#allocation8 + $0x2f0] sm:$0xff] }
  0x92   :  { %v444_v46 = vld [vmem:[#allocation8 + $0x550] sm:$0xff] }
  0x93   :  { %v508_v47 = vld [vmem:[#allocation8 + $0x750] sm:$0xff] }
  0x94   :  { %v300_v48 = vld [vmem:[#allocation8 + $0xd0] sm:$0xff] }
  0x95   :  { %v364_v49 = vld [vmem:[#allocation8 + $0x2d0] sm:$0xff] }
  0x96   :  { %v440_v50 = vld [vmem:[#allocation8 + $0x530] sm:$0xff] }
  0x97   :  { %v504_v51 = vld [vmem:[#allocation8 + $0x730] sm:$0xff] }
  0x98   :  { %v296_v52 = vld [vmem:[#allocation8 + $0xb0] sm:$0xff] }
  0x99   :  { %v360_v53 = vld [vmem:[#allocation8 + $0x2b0] sm:$0xff] }
  0x9a   :  { %v436_v54 = vld [vmem:[#allocation8 + $0x510] sm:$0xff] }
  0x9b   :  { %v500_v55 = vld [vmem:[#allocation8 + $0x710] sm:$0xff] }
  0x9c   :  { %v292_v56 = vld [vmem:[#allocation8 + $0x90] sm:$0xff] }
  0x9d   :  { %v356_v57 = vld [vmem:[#allocation8 + $0x290] sm:$0xff] }
  0x9e   :  { %v432_v58 = vld [vmem:[#allocation8 + $0x4f0] sm:$0xff] }
  0x9f   :  { %v496_v59 = vld [vmem:[#allocation8 + $0x6f0] sm:$0xff] }
  0xa0   :  { %v288_v60 = vld [vmem:[#allocation8 + $0x70] sm:$0xff] }
  0xa1   :  { %v352_v61 = vld [vmem:[#allocation8 + $0x270] sm:$0xff] }
  0xa2   :  { %v428_v62 = vld [vmem:[#allocation8 + $0x4d0] sm:$0xff] }
  0xa3   :  { %v492_v63 = vld [vmem:[#allocation8 + $0x6d0] sm:$0xff] }
  0xa4   :  { %v284_v0 = vld [vmem:[#allocation8 + $0x50] sm:$0xff] }
  0xba   :  { %v207_v4 = vpop.f32.mrf.mxu0  ;;  %v227_v5 = vpop.f32.mrf.mxu1 }
  0xbb   :  { %v208_v6 = vadd.f32 %v207_v4, %v182_v2  ;;  %v228_v7 = vadd.f32 %v227_v5, %v183_v3  ;;  %v424_v2 = vld [vmem:[#allocation8 + $0x4b0] sm:$0xff] }
  0xbc   :  { %v488_v3 = vld [vmem:[#allocation8 + $0x6b0] sm:$0xff] }
  0xbd   :  { %v1295_v8 = vmax.f32 %v208_v6, 0.0  ;;  %v1297_v9 = vmax.f32 %v228_v7, 0.0  ;;  %v280_v4 = vld [vmem:[#allocation8 + $0x30] sm:$0xff] }
  0xbe   :  { %v344_v5 = vld [vmem:[#allocation8 + $0x230] sm:$0xff] }
  0xbf   :  { %556 = vmatmul.f32.vlgmr.msrb.gmra.mxu0 %v1295_v8  ;;  %576 = vmatmul.f32.vlgmr.msrb.gmra.mxu1 %v1297_v9  ;;  %v420_v6 = vld [vmem:[#allocation8 + $0x490] sm:$0xff] }
  0xc0   :  { %700 = vmatpush.msrb.mxu0 %v336_v10  ;;  %720 = vmatpush.msrb.mxu1 %v400_v11  ;;  %v484_v7 = vld [vmem:[#allocation8 + $0x690] sm:$0xff] }
  0xc1   :  { %v247_v16 = vpop.f32.mrf.mxu2  ;;  %v267_v17 = vpop.f32.mrf.mxu3  ;;  %v276_v10 = vld [vmem:[#allocation8 + $0x10] sm:$0xff] }
  0xc2   :  { %v248_v20 = vadd.f32 %v247_v16, %v184_v12  ;;  %v268_v21 = vadd.f32 %v267_v17, %v185_v13  ;;  %701 = vmatpush.msrb.mxu0 %v332_v14  ;;  %721 = vmatpush.msrb.mxu1 %v396_v15  ;;  %v340_v11 = vld [vmem:[#allocation8 + $0x210] sm:$0xff]  ;;  %v337_v14 = vld [vmem:[#allocation8 + $0x1f8] sm:$0xff] }
  0xc3   :  { %v416_v12 = vld [vmem:[#allocation8 + $0x470] sm:$0xff]  ;;  %v401_v15 = vld [vmem:[#allocation8 + $0x3f8] sm:$0xff] }
  0xc4   :  { %v1301_v22 = vmax.f32 %v248_v20, 0.0  ;;  %v1303_v23 = vmax.f32 %v268_v21, 0.0  ;;  %702 = vmatpush.msrb.mxu0 %v328_v18  ;;  %722 = vmatpush.msrb.mxu1 %v392_v19  ;;  %v480_v13 = vld [vmem:[#allocation8 + $0x670] sm:$0xff]  ;;  %v333_v18 = vld [vmem:[#allocation8 + $0x1d8] sm:$0xff] }
  0xc5   :  { %v412_v16 = vld [vmem:[#allocation8 + $0x450] sm:$0xff]  ;;  %v397_v19 = vld [vmem:[#allocation8 + $0x3d8] sm:$0xff] }
  0xc6   :  { %596 = vmatmul.f32.vlgmr.msrb.gmra.mxu2 %v1301_v22  ;;  %616 = vmatmul.f32.vlgmr.msrb.gmra.mxu3 %v1303_v23  ;;  %v476_v17 = vld [vmem:[#allocation8 + $0x650] sm:$0xff] }
  0xc7   :  { %703 = vmatpush.msrb.mxu0 %v324_v24  ;;  %723 = vmatpush.msrb.mxu1 %v388_v25  ;;  %v408_v20 = vld [vmem:[#allocation8 + $0x430] sm:$0xff]  ;;  %v329_v24 = vld [vmem:[#allocation8 + $0x1b8] sm:$0xff] }
  0xc8   :  { %740 = vmatpush.msrb.mxu2 %v464_v26  ;;  %760 = vmatpush.msrb.mxu3 %v528_v27  ;;  %v472_v21 = vld [vmem:[#allocation8 + $0x630] sm:$0xff]  ;;  %v393_v25 = vld [vmem:[#allocation8 + $0x3b8] sm:$0xff] }
  0xc9   :  { %636 = vmatmul.f32.vlgmr.msra.gmra.mxu0 %v1295_v8  ;;  %724 = vmatpush.msrb.mxu1 %v384_v28  ;;  %v404_v26 = vld [vmem:[#allocation8 + $0x410] sm:$0xff]  ;;  %v325_v28 = vld [vmem:[#allocation8 + $0x198] sm:$0xff] }
  0xca   :  { %704 = vmatpush.msrb.mxu0 %v320_v29  ;;  %741 = vmatpush.msrb.mxu2 %v460_v30  ;;  %v468_v27 = vld [vmem:[#allocation8 + $0x610] sm:$0xff]  ;;  %v389_v29 = vld [vmem:[#allocation8 + $0x398] sm:$0xff] }
  0xcb   :  { %761 = vmatpush.msrb.mxu3 %v524_v31  ;;  %656 = vmatmul.f32.vlgmr.msra.gmra.mxu1 %v1297_v9  ;;  %v465_v30 = vld [vmem:[#allocation8 + $0x5f8] sm:$0xff] }
  0xcc   :  { %705 = vmatpush.msrb.mxu0 %v316_v32  ;;  %725 = vmatpush.msrb.mxu1 %v380_v33  ;;  %v529_v31 = vld [vmem:[#allocation8 + $0x7f8] sm:$0xff] }
  0xcd   :  { %742 = vmatpush.msrb.mxu2 %v456_v34  ;;  %762 = vmatpush.msrb.mxu3 %v520_v35  ;;  %v321_v32 = vld [vmem:[#allocation8 + $0x178] sm:$0xff] }
  0xce   :  { %706 = vmatpush.msrb.mxu0 %v312_v36  ;;  %726 = vmatpush.msrb.mxu1 %v376_v37  ;;  %v385_v33 = vld [vmem:[#allocation8 + $0x378] sm:$0xff] }
  0xcf   :  { %743 = vmatpush.msrb.mxu2 %v452_v38  ;;  %763 = vmatpush.msrb.mxu3 %v516_v39  ;;  %v461_v34 = vld [vmem:[#allocation8 + $0x5d8] sm:$0xff] }
  0xd0   :  { %676 = vmatmul.f32.vlgmr.msra.gmra.mxu2 %v1301_v22  ;;  %696 = vmatmul.f32.vlgmr.msra.gmra.mxu3 %v1303_v23  ;;  %v525_v35 = vld [vmem:[#allocation8 + $0x7d8] sm:$0xff] }
  0xd1   :  { %707 = vmatpush.msrb.mxu0 %v308_v40  ;;  %727 = vmatpush.msrb.mxu1 %v372_v41  ;;  %v317_v36 = vld [vmem:[#allocation8 + $0x158] sm:$0xff] }
  0xd2   :  { %744 = vmatpush.msrb.mxu2 %v448_v42  ;;  %764 = vmatpush.msrb.mxu3 %v512_v43  ;;  %v381_v37 = vld [vmem:[#allocation8 + $0x358] sm:$0xff] }
  0xd3   :  { %708 = vmatpush.msrb.mxu0 %v304_v44  ;;  %728 = vmatpush.msrb.mxu1 %v368_v45  ;;  %v457_v38 = vld [vmem:[#allocation8 + $0x5b8] sm:$0xff] }
  0xd4   :  { %745 = vmatpush.msrb.mxu2 %v444_v46  ;;  %765 = vmatpush.msrb.mxu3 %v508_v47  ;;  %v521_v39 = vld [vmem:[#allocation8 + $0x7b8] sm:$0xff] }
  0xd5   :  { %709 = vmatpush.msrb.mxu0 %v300_v48  ;;  %729 = vmatpush.msrb.mxu1 %v364_v49  ;;  %v313_v40 = vld [vmem:[#allocation8 + $0x138] sm:$0xff] }
  0xd6   :  { %746 = vmatpush.msrb.mxu2 %v440_v50  ;;  %766 = vmatpush.msrb.mxu3 %v504_v51  ;;  %v377_v41 = vld [vmem:[#allocation8 + $0x338] sm:$0xff] }
  0xd7   :  { %710 = vmatpush.msrb.mxu0 %v296_v52  ;;  %730 = vmatpush.msrb.mxu1 %v360_v53  ;;  %v453_v42 = vld [vmem:[#allocation8 + $0x598] sm:$0xff] }
  0xd8   :  { %747 = vmatpush.msrb.mxu2 %v436_v54  ;;  %767 = vmatpush.msrb.mxu3 %v500_v55  ;;  %v517_v43 = vld [vmem:[#allocation8 + $0x798] sm:$0xff] }
  0xd9   :  { %711 = vmatpush.msrb.mxu0 %v292_v56  ;;  %731 = vmatpush.msrb.mxu1 %v356_v57  ;;  %v309_v44 = vld [vmem:[#allocation8 + $0x118] sm:$0xff] }
  0xda   :  { %748 = vmatpush.msrb.mxu2 %v432_v58  ;;  %768 = vmatpush.msrb.mxu3 %v496_v59  ;;  %v373_v45 = vld [vmem:[#allocation8 + $0x318] sm:$0xff] }
  0xdb   :  { %712 = vmatpush.msrb.mxu0 %v288_v60  ;;  %732 = vmatpush.msrb.mxu1 %v352_v61  ;;  %v449_v46 = vld [vmem:[#allocation8 + $0x578] sm:$0xff] }
  0xdc   :  { %749 = vmatpush.msrb.mxu2 %v428_v62  ;;  %769 = vmatpush.msrb.mxu3 %v492_v63  ;;  %v513_v47 = vld [vmem:[#allocation8 + $0x778] sm:$0xff] }
  0xdd   :  { %713 = vmatpush.msrb.mxu0 %v284_v0  ;;  %733 = vmatpush.msrb.mxu1 %v348_v1  ;;  %v305_v48 = vld [vmem:[#allocation8 + $0xf8] sm:$0xff] }
  0xde   :  { %750 = vmatpush.msrb.mxu2 %v424_v2  ;;  %770 = vmatpush.msrb.mxu3 %v488_v3  ;;  %v369_v49 = vld [vmem:[#allocation8 + $0x2f8] sm:$0xff] }
  0xdf   :  { %714 = vmatpush.msrb.mxu0 %v280_v4  ;;  %734 = vmatpush.msrb.mxu1 %v344_v5  ;;  %v445_v50 = vld [vmem:[#allocation8 + $0x558] sm:$0xff] }
  0xe0   :  { %751 = vmatpush.msrb.mxu2 %v420_v6  ;;  %771 = vmatpush.msrb.mxu3 %v484_v7  ;;  %v509_v51 = vld [vmem:[#allocation8 + $0x758] sm:$0xff] }
  0xe1   :  { %715 = vmatpush.msrb.mxu0 %v276_v10  ;;  %735 = vmatpush.msrb.mxu1 %v340_v11  ;;  %v301_v52 = vld [vmem:[#allocation8 + $0xd8] sm:$0xff] }
  0xe2   :  { %752 = vmatpush.msrb.mxu2 %v416_v12  ;;  %772 = vmatpush.msrb.mxu3 %v480_v13  ;;  %v365_v53 = vld [vmem:[#allocation8 + $0x2d8] sm:$0xff] }
  0xe3   :  { %716 = vmatmul.f32.vlgmr.msrb.gmra.mxu0 %v1295_v8  ;;  %736 = vmatmul.f32.vlgmr.msrb.gmra.mxu1 %v1297_v9  ;;  %v441_v54 = vld [vmem:[#allocation8 + $0x538] sm:$0xff] }
  0xe4   :  { %780 = vmatpush.msra.mxu0 %v337_v14  ;;  %800 = vmatpush.msra.mxu1 %v401_v15  ;;  %v505_v55 = vld [vmem:[#allocation8 + $0x738] sm:$0xff] }
  0xe5   :  { %753 = vmatpush.msrb.mxu2 %v412_v16  ;;  %773 = vmatpush.msrb.mxu3 %v476_v17  ;;  %v297_v56 = vld [vmem:[#allocation8 + $0xb8] sm:$0xff] }
  0xe6   :  { %781 = vmatpush.msra.mxu0 %v333_v18  ;;  %801 = vmatpush.msra.mxu1 %v397_v19  ;;  %v361_v57 = vld [vmem:[#allocation8 + $0x2b8] sm:$0xff] }
  0xe7   :  { %754 = vmatpush.msrb.mxu2 %v408_v20  ;;  %774 = vmatpush.msrb.mxu3 %v472_v21  ;;  %v437_v58 = vld [vmem:[#allocation8 + $0x518] sm:$0xff] }
  0xe8   :  { %782 = vmatpush.msra.mxu0 %v329_v24  ;;  %802 = vmatpush.msra.mxu1 %v393_v25  ;;  %v501_v59 = vld [vmem:[#allocation8 + $0x718] sm:$0xff] }
  0xe9   :  { %755 = vmatpush.msrb.mxu2 %v404_v26  ;;  %775 = vmatpush.msrb.mxu3 %v468_v27  ;;  %v293_v60 = vld [vmem:[#allocation8 + $0x98] sm:$0xff] }
  0xea   :  { %756 = vmatmul.f32.vlgmr.msrb.gmra.mxu2 %v1301_v22  ;;  %776 = vmatmul.f32.vlgmr.msrb.gmra.mxu3 %v1303_v23  ;;  %v357_v61 = vld [vmem:[#allocation8 + $0x298] sm:$0xff] }
  0xeb   :  { %783 = vmatpush.msra.mxu0 %v325_v28  ;;  %803 = vmatpush.msra.mxu1 %v389_v29  ;;  %v433_v62 = vld [vmem:[#allocation8 + $0x4f8] sm:$0xff] }
  0xec   :  { %820 = vmatpush.msra.mxu2 %v465_v30  ;;  %840 = vmatpush.msra.mxu3 %v529_v31  ;;  %v497_v63 = vld [vmem:[#allocation8 + $0x6f8] sm:$0xff]  ;;  %v877_v30 = vld [vmem:[#allocation11 + $0x68] sm:$0xff] }
  0xed   :  { %784 = vmatpush.msra.mxu0 %v321_v32  ;;  %804 = vmatpush.msra.mxu1 %v385_v33  ;;  %v289_v0 = vld [vmem:[#allocation8 + $0x78] sm:$0xff]  ;;  %v873_v32 = vld [vmem:[#allocation11 + $0x48] sm:$0xff] }
  0xee   :  { %821 = vmatpush.msra.mxu2 %v461_v34  ;;  %841 = vmatpush.msra.mxu3 %v525_v35  ;;  %v353_v1 = vld [vmem:[#allocation8 + $0x278] sm:$0xff]  ;;  %v893_v33 = vld [vmem:[#allocation11 + $0xe8] sm:$0xff]  ;;  %v872_v34 = vld [vmem:[#allocation11 + $0x40] sm:$0xff] }
  0xef   :  { %785 = vmatpush.msra.mxu0 %v317_v36  ;;  %805 = vmatpush.msra.mxu1 %v381_v37  ;;  %v429_v2 = vld [vmem:[#allocation8 + $0x4d8] sm:$0xff]  ;;  %v892_v35 = vld [vmem:[#allocation11 + $0xe0] sm:$0xff] }
  0xf0   :  { %822 = vmatpush.msra.mxu2 %v457_v38  ;;  %842 = vmatpush.msra.mxu3 %v521_v39  ;;  %v493_v3 = vld [vmem:[#allocation8 + $0x6d8] sm:$0xff]  ;;  %v889_v39 = vld [vmem:[#allocation11 + $0xc8] sm:$0xff] }
  0xf1   :  { %786 = vmatpush.msra.mxu0 %v313_v40  ;;  %806 = vmatpush.msra.mxu1 %v377_v41  ;;  %v285_v4 = vld [vmem:[#allocation8 + $0x58] sm:$0xff]  ;;  %v868_v40 = vld [vmem:[#allocation11 + $0x20] sm:$0xff] }
  0xf2   :  { %823 = vmatpush.msra.mxu2 %v453_v42  ;;  %843 = vmatpush.msra.mxu3 %v517_v43  ;;  %v349_v5 = vld [vmem:[#allocation8 + $0x258] sm:$0xff]  ;;  %v888_v41 = vld [vmem:[#allocation11 + $0xc0] sm:$0xff] }
  0xf3   :  { %787 = vmatpush.msra.mxu0 %v309_v44  ;;  %807 = vmatpush.msra.mxu1 %v373_v45  ;;  %v425_v6 = vld [vmem:[#allocation8 + $0x4b8] sm:$0xff] }
  0xf4   :  { %824 = vmatpush.msra.mxu2 %v449_v46  ;;  %844 = vmatpush.msra.mxu3 %v513_v47  ;;  %v489_v7 = vld [vmem:[#allocation8 + $0x6b8] sm:$0xff]  ;;  %v865_v46 = vld [vmem:[#allocation11 + $0x8] sm:$0xff] }
  0xf5   :  { %788 = vmatpush.msra.mxu0 %v305_v48  ;;  %808 = vmatpush.msra.mxu1 %v369_v49  ;;  %v281_v10 = vld [vmem:[#allocation8 + $0x38] sm:$0xff]  ;;  %v885_v47 = vld [vmem:[#allocation11 + $0xa8] sm:$0xff]  ;;  %v864_v49 = vld [vmem:[#allocation11] sm:$0xff] }
  0xf6   :  { %825 = vmatpush.msra.mxu2 %v445_v50  ;;  %845 = vmatpush.msra.mxu3 %v509_v51  ;;  %v345_v11 = vld [vmem:[#allocation8 + $0x238] sm:$0xff]  ;;  %v884_v50 = vld [vmem:[#allocation11 + $0xa0] sm:$0xff] }
  0xf7   :  { %789 = vmatpush.msra.mxu0 %v301_v52  ;;  %809 = vmatpush.msra.mxu1 %v365_v53  ;;  %v421_v12 = vld [vmem:[#allocation8 + $0x498] sm:$0xff] }
  0xf8   :  { %826 = vmatpush.msra.mxu2 %v441_v54  ;;  %846 = vmatpush.msra.mxu3 %v505_v55  ;;  %v485_v13 = vld [vmem:[#allocation8 + $0x698] sm:$0xff]  ;;  %v909_v54 = vld [vmem:[#allocation11 + $0x168] sm:$0xff] }
  0xf9   :  { %790 = vmatpush.msra.mxu0 %v297_v56  ;;  %810 = vmatpush.msra.mxu1 %v361_v57  ;;  %v277_v14 = vld [vmem:[#allocation8 + $0x18] sm:$0xff]  ;;  %v881_v55 = vld [vmem:[#allocation11 + $0x88] sm:$0xff]  ;;  %v908_v56 = vld [vmem:[#allocation11 + $0x160] sm:$0xff] }
  0xfa   :  { %827 = vmatpush.msra.mxu2 %v437_v58  ;;  %847 = vmatpush.msra.mxu3 %v501_v59  ;;  %v341_v15 = vld [vmem:[#allocation8 + $0x218] sm:$0xff]  ;;  %v1319_v57 = vld [vmem:[#allocation10] sm:$0xf]  ;;  %v880_v58 = vld [vmem:[#allocation11 + $0x80] sm:$0xff] }
  0xfb   :  { %791 = vmatpush.msra.mxu0 %v293_v60  ;;  %811 = vmatpush.msra.mxu1 %v357_v61  ;;  %v417_v16 = vld [vmem:[#allocation8 + $0x478] sm:$0xff]  ;;  %v532_v60 = vperm.slane %v1319_v57, 0 }
  0xfc   :  { %828 = vmatpush.msra.mxu2 %v433_v62  ;;  %848 = vmatpush.msra.mxu3 %v497_v63  ;;  %v481_v17 = vld [vmem:[#allocation8 + $0x678] sm:$0xff] }
  0xfd   :  { %792 = vmatpush.msra.mxu0 %v289_v0  ;;  %812 = vmatpush.msra.mxu1 %v353_v1  ;;  %v413_v18 = vld [vmem:[#allocation8 + $0x458] sm:$0xff]  ;;  %v905_v0 = vld [vmem:[#allocation11 + $0x148] sm:$0xff]  ;;  %v904_v1 = vld [vmem:[#allocation11 + $0x140] sm:$0xff] }
  0xfe   :  { %829 = vmatpush.msra.mxu2 %v429_v2  ;;  %849 = vmatpush.msra.mxu3 %v493_v3  ;;  %v477_v19 = vld [vmem:[#allocation8 + $0x658] sm:$0xff] }
  0xff   :  { %793 = vmatpush.msra.mxu0 %v285_v4  ;;  %813 = vmatpush.msra.mxu1 %v349_v5  ;;  %v879_v20 = vld [vmem:[#allocation11 + $0x78] sm:$0xff]  ;;  %v878_v26 = vld [vmem:[#allocation11 + $0x70] sm:$0xff] }
 0x100   :  { %830 = vmatpush.msra.mxu2 %v425_v6  ;;  %850 = vmatpush.msra.mxu3 %v489_v7  ;;  %v895_v21 = vld [vmem:[#allocation11 + $0xf8] sm:$0xff]  ;;  %v894_v27 = vld [vmem:[#allocation11 + $0xf0] sm:$0xff]  ;;  %v901_v6 = vld [vmem:[#allocation11 + $0x128] sm:$0xff] }
 0x101   :  { %794 = vmatpush.msra.mxu0 %v281_v10  ;;  %814 = vmatpush.msra.mxu1 %v345_v11  ;;  %v409_v24 = vld [vmem:[#allocation8 + $0x438] sm:$0xff]  ;;  %v533_v10 = vperm.slane %v1319_v57, 1 }
 0x102   :  { %831 = vmatpush.msra.mxu2 %v421_v12  ;;  %851 = vmatpush.msra.mxu3 %v485_v13  ;;  %v473_v25 = vld [vmem:[#allocation8 + $0x638] sm:$0xff]  ;;  %v900_v12 = vld [vmem:[#allocation11 + $0x120] sm:$0xff] }
 0x103   :  { %795 = vmatpush.msra.mxu0 %v277_v14  ;;  %815 = vmatpush.msra.mxu1 %v341_v15  ;;  %v405_v28 = vld [vmem:[#allocation8 + $0x418] sm:$0xff] }
 0x104   :  { %832 = vmatpush.msra.mxu2 %v417_v16  ;;  %852 = vmatpush.msra.mxu3 %v481_v17  ;;  %v469_v29 = vld [vmem:[#allocation8 + $0x618] sm:$0xff] }
 0x105   :  { %796 = vmatmul.f32.vlgmr.msra.gmra.mxu0 %v1295_v8  ;;  %816 = vmatmul.f32.vlgmr.msra.gmra.mxu1 %v1297_v9  ;;  %v876_v8 = vld [vmem:[#allocation11 + $0x60] sm:$0xff]  ;;  %v875_v9 = vld [vmem:[#allocation11 + $0x58] sm:$0xff]  ;;  %v874_v31 = vld [vmem:[#allocation11 + $0x50] sm:$0xff] }
 0x106   :  { %833 = vmatpush.msra.mxu2 %v413_v18  ;;  %853 = vmatpush.msra.mxu3 %v477_v19  ;;  %v871_v36 = vld [vmem:[#allocation11 + $0x38] sm:$0xff]  ;;  %v890_v38 = vld [vmem:[#allocation11 + $0xd0] sm:$0xff] }
 0x107   :  { %932 = vmatpush.msrb.mxu0 %v879_v20  ;;  %952 = vmatpush.msrb.mxu1 %v895_v21  ;;  %v891_v37 = vld [vmem:[#allocation11 + $0xd8] sm:$0xff]  ;;  %v866_v44 = vld [vmem:[#allocation11 + $0x10] sm:$0xff] }
 0x108   :  { %834 = vmatpush.msra.mxu2 %v409_v24  ;;  %854 = vmatpush.msra.mxu3 %v473_v25  ;;  %v867_v42 = vld [vmem:[#allocation11 + $0x18] sm:$0xff]  ;;  %v886_v45 = vld [vmem:[#allocation11 + $0xb0] sm:$0xff]  ;;  %v897_v24 = vld [vmem:[#allocation11 + $0x108] sm:$0xff] }
 0x109   :  { %933 = vmatpush.msrb.mxu0 %v878_v26  ;;  %953 = vmatpush.msrb.mxu1 %v894_v27  ;;  %v887_v43 = vld [vmem:[#allocation11 + $0xb8] sm:$0xff]  ;;  %v910_v52 = vld [vmem:[#allocation11 + $0x170] sm:$0xff]  ;;  %v896_v25 = vld [vmem:[#allocation11 + $0x100] sm:$0xff] }
 0x10a   :  { %835 = vmatpush.msra.mxu2 %v405_v28  ;;  %855 = vmatpush.msra.mxu3 %v469_v29  ;;  %v911_v48 = vld [vmem:[#allocation11 + $0x178] sm:$0xff]  ;;  %v882_v53 = vld [vmem:[#allocation11 + $0x90] sm:$0xff] }
 0x10b   :  { %836 = vmatmul.f32.vlgmr.msra.gmra.mxu2 %v1301_v22  ;;  %856 = vmatmul.f32.vlgmr.msra.gmra.mxu3 %v1303_v23  ;;  %v870_v22 = vld [vmem:[#allocation11 + $0x30] sm:$0xff]  ;;  %v869_v23 = vld [vmem:[#allocation11 + $0x28] sm:$0xff]  ;;  %v883_v51 = vld [vmem:[#allocation11 + $0x98] sm:$0xff] }
 0x10c   :  { %934 = vmatpush.msrb.mxu0 %v877_v30  ;;  %954 = vmatpush.msrb.mxu1 %v893_v33  ;;  %v907_v59 = vld [vmem:[#allocation11 + $0x158] sm:$0xff]  ;;  %v906_v61 = vld [vmem:[#allocation11 + $0x150] sm:$0xff] }
 0x10d   :  { %972 = vmatpush.msrb.mxu2 %v911_v48  ;;  %v903_v2 = vld [vmem:[#allocation11 + $0x138] sm:$0xff]  ;;  %v902_v5 = vld [vmem:[#allocation11 + $0x130] sm:$0xff] }
 0x10e   :  { %935 = vmatpush.msrb.mxu0 %v876_v8  ;;  %955 = vmatpush.msrb.mxu1 %v892_v35  ;;  %v899_v18 = vld [vmem:[#allocation11 + $0x118] sm:$0xff]  ;;  %v898_v20 = vld [vmem:[#allocation11 + $0x110] sm:$0xff]  ;;  %v921_v35 = vld [vmem:[#allocation11 + $0x1c8] sm:$0xff] }
 0x10f   :  { %973 = vmatpush.msrb.mxu2 %v910_v52  ;;  %v927_v28 = vld [vmem:[#allocation11 + $0x1f8] sm:$0xff]  ;;  %v926_v29 = vld [vmem:[#allocation11 + $0x1f0] sm:$0xff]  ;;  %v912_v52 = vld [vmem:[#allocation11 + $0x180] sm:$0xff] }
 0x110   :  { %936 = vmatpush.msrb.mxu0 %v875_v9  ;;  %956 = vmatpush.msrb.mxu1 %v891_v37  ;;  %v925_v9 = vld [vmem:[#allocation11 + $0x1e8] sm:$0xff]  ;;  %v923_v33 = vld [vmem:[#allocation11 + $0x1d8] sm:$0xff]  ;;  %v534_v37 = vperm.slane %v1319_v57, 2  ;;  %v914_v48 = vld [vmem:[#allocation11 + $0x190] sm:$0xff] }
 0x111   :  { %974 = vmatpush.msrb.mxu2 %v909_v54  ;;  %992 = vmatpush.msrb.mxu3 %v927_v28 }
 0x112   :  { %937 = vmatpush.msrb.mxu0 %v874_v31  ;;  %957 = vmatpush.msrb.mxu1 %v890_v38  ;;  %v919_v38 = vld [vmem:[#allocation11 + $0x1b8] sm:$0xff] }
 0x113   :  { %975 = vmatpush.msrb.mxu2 %v908_v56  ;;  %993 = vmatpush.msrb.mxu3 %v926_v29 }
 0x114   :  { %938 = vmatpush.msrb.mxu0 %v873_v32  ;;  %958 = vmatpush.msrb.mxu1 %v889_v39  ;;  %v924_v32 = vld [vmem:[#allocation11 + $0x1e0] sm:$0xff]  ;;  %v917_v39 = vld [vmem:[#allocation11 + $0x1a8] sm:$0xff] }
 0x115   :  { %976 = vmatpush.msrb.mxu2 %v907_v59  ;;  %994 = vmatpush.msrb.mxu3 %v925_v9 }
 0x116   :  { %939 = vmatpush.msrb.mxu0 %v872_v34  ;;  %959 = vmatpush.msrb.mxu1 %v888_v41  ;;  %v922_v34 = vld [vmem:[#allocation11 + $0x1d0] sm:$0xff]  ;;  %v916_v41 = vld [vmem:[#allocation11 + $0x1a0] sm:$0xff] }
 0x117   :  { %977 = vmatpush.msrb.mxu2 %v906_v61  ;;  %995 = vmatpush.msrb.mxu3 %v924_v32 }
 0x118   :  { %940 = vmatpush.msrb.mxu0 %v871_v36  ;;  %960 = vmatpush.msrb.mxu1 %v887_v43  ;;  %v920_v36 = vld [vmem:[#allocation11 + $0x1c0] sm:$0xff] }
 0x119   :  { %978 = vmatpush.msrb.mxu2 %v905_v0  ;;  %996 = vmatpush.msrb.mxu3 %v923_v33  ;;  %v1045_v0 = vld [vmem:[%s1337_s6] ss:$0 sm:$0xff] }
 0x11a   :  { %941 = vmatpush.msrb.mxu0 %v870_v22  ;;  %961 = vmatpush.msrb.mxu1 %v886_v45  ;;  %v915_v45 = vld [vmem:[#allocation11 + $0x198] sm:$0xff] }
 0x11b   :  { %979 = vmatpush.msrb.mxu2 %v904_v1  ;;  %997 = vmatpush.msrb.mxu3 %v922_v34 }
 0x11c   :  { %942 = vmatpush.msrb.mxu0 %v869_v23  ;;  %962 = vmatpush.msrb.mxu1 %v885_v47  ;;  %v918_v23 = vld [vmem:[#allocation11 + $0x1b0] sm:$0xff] }
 0x11d   :  { %980 = vmatpush.msrb.mxu2 %v903_v2  ;;  %998 = vmatpush.msrb.mxu3 %v921_v35 }
 0x11e   :  { %943 = vmatpush.msrb.mxu0 %v868_v40  ;;  %963 = vmatpush.msrb.mxu1 %v884_v50  ;;  %v913_v50 = vld [vmem:[#allocation11 + $0x188] sm:$0xff] }
 0x11f   :  { %981 = vmatpush.msrb.mxu2 %v902_v5  ;;  %999 = vmatpush.msrb.mxu3 %v920_v36 }
 0x120   :  { %944 = vmatpush.msrb.mxu0 %v867_v42  ;;  %964 = vmatpush.msrb.mxu1 %v883_v51 }
 0x121   :  { %982 = vmatpush.msrb.mxu2 %v901_v6  ;;  %1000 = vmatpush.msrb.mxu3 %v919_v38 }
 0x122   :  { %945 = vmatpush.msrb.mxu0 %v866_v44  ;;  %965 = vmatpush.msrb.mxu1 %v882_v53  ;;  %v535_v53 = vperm.slane %v1319_v57, 3 }
 0x123   :  { %983 = vmatpush.msrb.mxu2 %v900_v12  ;;  %1001 = vmatpush.msrb.mxu3 %v918_v23 }
 0x124   :  { %946 = vmatpush.msrb.mxu0 %v865_v46  ;;  %966 = vmatpush.msrb.mxu1 %v881_v55 }
 0x125   :  { %984 = vmatpush.msrb.mxu2 %v899_v18  ;;  %1002 = vmatpush.msrb.mxu3 %v917_v39 }
 0x126   :  { %947 = vmatpush.msrb.mxu0 %v864_v49  ;;  %967 = vmatpush.msrb.mxu1 %v880_v58 }
 0x127   :  { %985 = vmatpush.msrb.mxu2 %v898_v20  ;;  %1003 = vmatpush.msrb.mxu3 %v916_v41 }
 0x129   :  { %986 = vmatpush.msrb.mxu2 %v897_v24  ;;  %1004 = vmatpush.msrb.mxu3 %v915_v45 }
 0x12b   :  { %987 = vmatpush.msrb.mxu2 %v896_v25  ;;  %1005 = vmatpush.msrb.mxu3 %v914_v48 }
 0x12d   :  { %1006 = vmatpush.msrb.mxu3 %v913_v50 }
 0x12f   :  { %1007 = vmatpush.msrb.mxu3 %v912_v52 }
 0x13c   :  { %v557_v62 = vpop.f32.mrf.mxu0  ;;  %v577_v3 = vpop.f32.mrf.mxu1 }
 0x13d   :  { %v558_v63 = vadd.f32 %v557_v62, %v532_v60 }
 0x13f   :  { %v578_v4 = vadd.f32 %v577_v3, %v558_v63 }
 0x146   :  { %v637_v13 = vpop.f32.mrf.mxu0 }
 0x147   :  { %v638_v16 = vadd.f32 %v637_v13, %v533_v10 }
 0x148   :  { %v657_v19 = vpop.f32.mrf.mxu1 }
 0x149   :  { %v597_v7 = vpop.f32.mrf.mxu2  ;;  %v617_v14 = vpop.f32.mrf.mxu3  ;;  %v658_v21 = vadd.f32 %v657_v19, %v638_v16 }
 0x14a   :  { %v598_v11 = vadd.f32 %v597_v7, %v578_v4 }
 0x14c   :  { %v618_v15 = vadd.f32 %v617_v14, %v598_v11 }
 0x14e   :  { %v860_v17 = vmax.f32 %v618_v15, 0.0 }
 0x150   :  { %948 = vmatmul.f32.vlgmr.msrb.gmra.mxu0 %v860_v17 }
 0x153   :  { %v677_v26 = vpop.f32.mrf.mxu2  ;;  %v697_v30 = vpop.f32.mrf.mxu3 }
 0x154   :  { %v678_v27 = vadd.f32 %v677_v26, %v658_v21 }
 0x156   :  { %v698_v8 = vadd.f32 %v697_v30, %v678_v27 }
 0x158   :  { %v861_v31 = vmax.f32 %v698_v8, 0.0 }
 0x15a   :  { %968 = vmatmul.f32.vlgmr.msrb.gmra.mxu1 %v861_v31 }
 0x160   :  { %v717_v22 = vpop.f32.mrf.mxu0  ;;  %v737_v42 = vpop.f32.mrf.mxu1 }
 0x161   :  { %v718_v40 = vadd.f32 %v717_v22, %v534_v37 }
 0x163   :  { %v738_v43 = vadd.f32 %v737_v42, %v718_v40 }
 0x16d   :  { %v757_v44 = vpop.f32.mrf.mxu2  ;;  %v777_v47 = vpop.f32.mrf.mxu3 }
 0x16e   :  { %v758_v46 = vadd.f32 %v757_v44, %v738_v43 }
 0x170   :  { %v778_v49 = vadd.f32 %v777_v47, %v758_v46 }
 0x172   :  { %v862_v51 = vmax.f32 %v778_v49, 0.0 }
 0x174   :  { %988 = vmatmul.f32.vlgmr.msrb.gmra.mxu2 %v862_v51 }
 0x182   :  { %v797_v54 = vpop.f32.mrf.mxu0  ;;  %v817_v56 = vpop.f32.mrf.mxu1 }
 0x183   :  { %v798_v55 = vadd.f32 %v797_v54, %v535_v53 }
 0x185   :  { %v818_v58 = vadd.f32 %v817_v56, %v798_v55 }
 0x18e   :  { %v837_v59 = vpop.f32.mrf.mxu2  ;;  %v857_v61 = vpop.f32.mrf.mxu3 }
 0x18f   :  { %v838_v60 = vadd.f32 %v837_v59, %v818_v58 }
 0x191   :  { %v858_v62 = vadd.f32 %v857_v61, %v838_v60 }
 0x193   :  { %v863_v63 = vmax.f32 %v858_v62, 0.0 }
 0x195   :  { %1008 = vmatmul.f32.vlgmr.msrb.gmra.mxu3 %v863_v63 }
 0x1cd   :  { %v949_v1 = vpop.f32.mrf.mxu0 }
 0x1ce   :  { %v950_v3 = vadd.f32 %v1045_v0, %v949_v1 }
 0x1d7   :  { %v969_v2 = vpop.f32.mrf.mxu1 }
 0x1d8   :  { %v970_v5 = vadd.f32 %v969_v2, %v950_v3 }
 0x1f7   :  { %v989_v4 = vpop.f32.mrf.mxu2 }
 0x1f8   :  { %v990_v57 = vadd.f32 %v989_v4, %v970_v5 }
 0x218   :  { %v1009_v6 = vpop.f32.mrf.mxu3 }
 0x219   :  { %v1010_v7 = vadd.f32 %v1009_v6, %v990_v57 }
 0x21b   :  { %1046 = vtanh.f32 %v1010_v7 }
 0x221   :  { %v1047_v10 = vpop.eup %1046 }
 0x222   :  { %1013 = vst [vmem:[#allocation13] sm:$0xff] %v1047_v10 }
 0x223   :  { %1024 = dma.vmem_to_hbm [thread:$0]  %s1020_s9, 128, %s1022_s12, [#allocation4]  }
 0x224   :  { %1224 = dma.done.wait [#allocation4], 128  }
 0x225   :  { %1225 = vsyncadd [#allocation4], 4294967168 }
 0x226   :  { %1029 = vsyncpa [#allocation3], 1 }
 0x227   :  { %1030 = vsyncpa [#allocation6], 1 }
 0x228   :  { %1031 = vsyncpa [#allocation9], 1 }
 0x229   :  { %1032 = vsyncpa [#allocation12], 1 }
 0x22a   :  { %1033 = vsyncpa [#allocation4], 1 }

</bundles_post_ra>
